<compile_context>
chip_gen: v5e
topology: v5e:2x2
jax: 0.10.0
libtpu: 0.0.40
codegen_flags: <defaults>
</compile_context>

<pallas_src>
import functools
import math

import jax
import jax.numpy as jnp
from jax import lax
from jax.experimental import pallas as pl
from jax.experimental.pallas import tpu as pltpu

_LANE = 128
_SQRT_2PI = math.sqrt(2.0 * math.pi)
_LOG3 = math.log(3.0)


def _round_up(v, m):
    return ((v + m - 1) // m) * m


# --------------------------- fused forward kernel -----------------------------
def _fused_kernel(n_layers, mat_ref, sigw_ref, alpha_ref, x_ref, *rest):
    # mat_ref:   (G, N, N) f32  graph distance matrices
    # sigw_ref:  (G, 1, N) f32  sigma.weight.reshape(n_graph, 1, -1)
    # alpha_ref: (G, 1, 1) f32  softmax(alpha)
    # x_ref:     (N, P0)   f32  batch stacked along lanes, zero-padded to 128-lane
    # rest:      n_layers block-diagonal padded weights (P_i, P_{i+1}),
    #            then out_ref (N, P_L) and prior_ref (N, N).
    w_refs = rest[:n_layers]
    out_ref = rest[n_layers]
    prior_ref = rest[n_layers + 1]

    G, N, _ = mat_ref.shape

    # ---------------- STS prior (all f32 elementwise) ----------------
    sig = sigw_ref[...]                                  # (G, 1, N)
    sig = jax.nn.sigmoid(sig * 5.0) + 1e-5
    sig = jnp.exp(sig * _LOG3) - 1.0                     # 3**sig - 1

    # Hoist divides to O(G*N) exact reciprocals, then multiply over (G,N,N).
    inv_two_sig2 = pl.reciprocal(2.0 * sig * sig)
    inv_gauss_norm = pl.reciprocal(_SQRT_2PI * sig)

    mat = mat_ref[...]                                   # (G, N, N)
    p = jnp.exp(-mat * inv_two_sig2) * inv_gauss_norm

    # Mask computed in-kernel: masked where matrix == 0, diagonal never masked.
    row = lax.broadcasted_iota(jnp.int32, (N, N), 0)
    col = lax.broadcasted_iota(jnp.int32, (N, N), 1)
    off_diag = (row != col)[None, :, :]                  # (1, N, N)
    p = jnp.where((mat == 0.0) & off_diag, 0.0, p)

    # Column-normalize (sum over dim 1), then softmax(alpha)-weighted graph sum
    # as a single broadcasted-multiply + VPU reduction over the leading axis.
    colsum = jnp.sum(p, axis=1, keepdims=True) + 1e-8    # (G, 1, N)
    p = p * pl.reciprocal(colsum)
    prior = jnp.sum(alpha_ref[...] * p, axis=0)          # (N, N)
    prior_ref[...] = prior

    # ---------------- GCN layers: activations stay resident ----------------
    # h is (N, B*C padded to 128 lanes). Each layer = two lane-dense MXU matmuls
    # covering the whole batch at once (batch folded block-diagonally into W).
    # NOTE: for larger shapes on v6e/v7x, cast prior/h/w to bfloat16 here with
    # preferred_element_type=f32 to hit the native bf16 MXU path.
    h = x_ref[...]
    for w_ref in w_refs:
        wx = jnp.dot(prior, h, preferred_element_type=jnp.float32)
        h = jnp.maximum(
            jnp.dot(wx, w_ref[...], preferred_element_type=jnp.float32), 0.0)
    out_ref[...] = h.astype(out_ref.dtype)


# ------------------------------- wrapper --------------------------------------
def multiple_gcn_forward(x, matrices, sigma_weight, alpha, layer_weights):
    """x: (B,N,Cin); matrices: (G,N,N); sigma_weight: (N,G) (torch Linear(n_graph,d).weight);
    alpha: (G,); layer_weights: list of torch-Linear-style (Cout_i, Cin_i) weights."""
    B, N, Cin = x.shape
    G = matrices.shape[0]
    n_layers = len(layer_weights)

    # One-time wrapper plumbing (plain XLA ops, not per-kernel-step work).
    sigw = jnp.reshape(sigma_weight.astype(jnp.float32), (G, 1, N))
    alpha_sm = jax.nn.softmax(alpha.astype(jnp.float32), axis=0).reshape(G, 1, 1)

    # Per-layer feature widths and their 128-lane padded batch-stacked widths.
    feat = [Cin] + [int(w.shape[0]) for w in layer_weights]
    padded = [_round_up(max(B * f, 1), _LANE) for f in feat]

    # Stack the batch along lanes: (B,N,Cin) -> (N, B*Cin), pad lanes to 128-multiple.
    xs = jnp.transpose(x.astype(jnp.float32), (1, 0, 2)).reshape(N, B * Cin)
    xs = jnp.pad(xs, ((0, 0), (0, padded[0] - B * Cin)))

    # Pre-transpose each W to (Cin_i, Cout_i), fold batch in block-diagonally
    # (kron(I_B, W^T)), zero-pad to (padded_in, padded_out) so matmuls chain.
    w_blocks = []
    eye_b = jnp.eye(B, dtype=jnp.float32)
    for i, w in enumerate(layer_weights):
        wt = jnp.asarray(w, jnp.float32).T                       # (Cin_i, Cout_i)
        wb = jnp.kron(eye_b, wt)                                 # (B*Cin_i, B*Cout_i)
        wb = jnp.pad(wb, ((0, padded[i] - wb.shape[0]),
                          (0, padded[i + 1] - wb.shape[1])))
        w_blocks.append(wb)

    vmem = pl.BlockSpec(memory_space=pltpu.MemorySpace.VMEM)
    out_padded, prior = pl.pallas_call(
        functools.partial(_fused_kernel, n_layers),
        out_shape=(
            jax.ShapeDtypeStruct((N, padded[-1]), jnp.float32),  # activations (lane-dense)
            jax.ShapeDtypeStruct((N, N), jnp.float32),           # prior
        ),
        in_specs=[vmem] * (4 + n_layers),
        out_specs=(vmem, vmem),
        # No grid: everything (a few KiB) fits VMEM on v5e/v6e/v7x. If N grows,
        # add a row-tiled grid over N (parallel) so v7x's 2 TCs split the work
        # and the untiled (G,N,N) load stays under the 32 MiB scoped VMEM limit.
    )(matrices.astype(jnp.float32), sigw, alpha_sm, xs, *w_blocks)

    Cout = feat[-1]
    out = out_padded[:, :B * Cout].reshape(N, B, Cout).transpose(1, 0, 2)
    return out, prior


# ------------------------- pure-JAX reference ---------------------------------
def reference(x, matrices, sigma_weight, alpha, layer_weights):
    G, N, _ = matrices.shape
    sig = jnp.reshape(sigma_weight, (G, 1, N))
    sig = jax.nn.sigmoid(sig * 5.0) + 1e-5
    sig = jnp.power(3.0, sig) - 1.0
    e = jnp.exp(-matrices / (2.0 * sig ** 2))
    prior = e / (math.sqrt(2.0 * math.pi) * sig)
    mask = (matrices == 0.0)
    idx = jnp.arange(N)
    mask = mask.at[:, idx, idx].set(False)
    prior = jnp.where(mask, 0.0, prior)
    prior = prior / (prior.sum(1, keepdims=True) + 1e-8)
    prior = jnp.einsum('gij,g->ij', prior, jax.nn.softmax(alpha, axis=0))
    for w in layer_weights:
        x = jax.nn.relu(jnp.matmul(prior, x) @ w.T)
    return x, prior


if __name__ == "__main__":
    jax.config.update("jax_default_matmul_precision", "highest")

    key = jax.random.PRNGKey(0)
    G, N, B = 3, 16, 2            # n_graph, graph nodes (d), batch
    Cin, Cout = 8, 16             # in_channels, out_channels
    n_layers = 2

    k1, k2, k3, kw1, kw2 = jax.random.split(key, 5)

    # Deterministic synthetic graph distance matrices: symmetric, some zeros,
    # zero diagonal (so the mask path is exercised).
    raw = jax.random.uniform(k1, (G, N, N), dtype=jnp.float32)
    raw = 0.5 * (raw + jnp.swapaxes(raw, 1, 2))
    matrices = jnp.where(raw < 0.3, 0.0, raw)
    matrices = matrices * (1.0 - jnp.eye(N, dtype=jnp.float32))[None]

    # Parameters (shapes follow the torch module: Linear(n_graph, d).weight -> (d, n_graph)).
    sigma_weight = 0.1 * jax.random.normal(k2, (N, G), dtype=jnp.float32)
    alpha = jnp.ones((G,), jnp.float32) / G
    w0 = jax.random.normal(kw1, (Cout, Cin), dtype=jnp.float32) / math.sqrt(Cin)
    w1 = jax.random.normal(kw2, (Cout, Cout), dtype=jnp.float32) / math.sqrt(Cout)
    layer_weights = [w0, w1][:n_layers]

    x = jax.random.normal(k3, (B, N, Cin), dtype=jnp.float32)

    out, prior = multiple_gcn_forward(x, matrices, sigma_weight, alpha, layer_weights)
    jax.block_until_ready((out, prior))

    ref_out, ref_prior = reference(x, matrices, sigma_weight, alpha, layer_weights)
    assert jnp.allclose(prior, ref_prior, atol=1e-5, rtol=1e-5), "prior mismatch"
    assert jnp.allclose(out, ref_out, atol=1e-4, rtol=1e-4), "output mismatch"

    print("KERNEL_OK")
</pallas_src>

<mosaic_0001>
module attributes {stable_mosaic.version = 11 : i64} {
  func.func @_fused_kernel(%arg0: memref<3x16x16xf32, #tpu.memory_space<vmem>>, %arg1: memref<3x1x16xf32, #tpu.memory_space<vmem>>, %arg2: memref<3x1x1xf32, #tpu.memory_space<vmem>>, %arg3: memref<16x128xf32, #tpu.memory_space<vmem>>, %arg4: memref<128x128xf32, #tpu.memory_space<vmem>>, %arg5: memref<128x128xf32, #tpu.memory_space<vmem>>, %arg6: memref<16x128xf32, #tpu.memory_space<vmem>>, %arg7: memref<16x16xf32, #tpu.memory_space<vmem>>) attributes {dimension_semantics = [], scalar_prefetch = 0 : i64, scratch_operands = 0 : i64, tpu.core_type = #tpu.core_type<tc>} {
    %c0 = arith.constant 0 : index
    %c0_0 = arith.constant 0 : index
    %c0_1 = arith.constant 0 : index
    %0 = vector.load %arg1[%c0, %c0_0, %c0_1] : memref<3x1x16xf32, #tpu.memory_space<vmem>>, vector<3x1x16xf32>
    %cst = arith.constant 5.000000e+00 : f32
    %1 = vector.broadcast %cst : f32 to vector<3x1x16xf32>
    %2 = arith.mulf %0, %1 : vector<3x1x16xf32>
    %3 = arith.negf %2 : vector<3x1x16xf32>
    %4 = math.exp %3 : vector<3x1x16xf32>
    %cst_2 = arith.constant 1.000000e+00 : f32
    %5 = vector.broadcast %cst_2 : f32 to vector<3x1x16xf32>
    %6 = arith.addf %5, %4 : vector<3x1x16xf32>
    %7 = arith.divf %5, %6 : vector<3x1x16xf32>
    %cst_3 = arith.constant 9.99999974E-6 : f32
    %8 = vector.broadcast %cst_3 : f32 to vector<3x1x16xf32>
    %9 = arith.addf %7, %8 : vector<3x1x16xf32>
    %cst_4 = arith.constant 1.09861231 : f32
    %10 = vector.broadcast %cst_4 : f32 to vector<3x1x16xf32>
    %11 = arith.mulf %9, %10 : vector<3x1x16xf32>
    %12 = math.exp %11 : vector<3x1x16xf32>
    %cst_5 = arith.constant 1.000000e+00 : f32
    %13 = vector.broadcast %cst_5 : f32 to vector<3x1x16xf32>
    %14 = arith.subf %12, %13 : vector<3x1x16xf32>
    %cst_6 = arith.constant 2.000000e+00 : f32
    %15 = vector.broadcast %cst_6 : f32 to vector<3x1x16xf32>
    %16 = arith.mulf %15, %14 : vector<3x1x16xf32>
    %17 = arith.mulf %16, %14 : vector<3x1x16xf32>
    %18 = tpu.reciprocal %17 : vector<3x1x16xf32> -> vector<3x1x16xf32>
    %cst_7 = arith.constant 2.50662827 : f32
    %19 = vector.broadcast %cst_7 : f32 to vector<3x1x16xf32>
    %20 = arith.mulf %19, %14 : vector<3x1x16xf32>
    %21 = tpu.reciprocal %20 : vector<3x1x16xf32> -> vector<3x1x16xf32>
    %c0_8 = arith.constant 0 : index
    %c0_9 = arith.constant 0 : index
    %c0_10 = arith.constant 0 : index
    %22 = vector.load %arg0[%c0_8, %c0_9, %c0_10] : memref<3x16x16xf32, #tpu.memory_space<vmem>>, vector<3x16x16xf32>
    %cst_11 = arith.constant 0.000000e+00 : f32
    %23 = vector.broadcast %cst_11 : f32 to vector<3x16x16xf32>
    %24 = arith.subf %23, %22 : vector<3x16x16xf32>
    %25 = vector.broadcast %18 : vector<3x1x16xf32> to vector<3x16x16xf32>
    %26 = arith.mulf %24, %25 : vector<3x16x16xf32>
    %27 = math.exp %26 : vector<3x16x16xf32>
    %28 = vector.broadcast %21 : vector<3x1x16xf32> to vector<3x16x16xf32>
    %29 = arith.mulf %27, %28 : vector<3x16x16xf32>
    %30 = tpu.iota {dimensions = array<i32: 0>} : vector<16x16xi32>
    %31 = tpu.iota {dimensions = array<i32: 1>} : vector<16x16xi32>
    %32 = arith.cmpi ne, %30, %31 : vector<16x16xi32>
    %33 = vector.shape_cast %32 : vector<16x16xi1> to vector<1x16x16xi1>
    %cst_12 = arith.constant 0.000000e+00 : f32
    %34 = vector.broadcast %cst_12 : f32 to vector<3x16x16xf32>
    %35 = arith.cmpf oeq, %22, %34 : vector<3x16x16xf32>
    %36 = vector.broadcast %33 : vector<1x16x16xi1> to vector<3x16x16xi1>
    %37 = arith.andi %35, %36 : vector<3x16x16xi1>
    %cst_13 = arith.constant 0.000000e+00 : f32
    %38 = vector.broadcast %cst_13 : f32 to vector<3x16x16xf32>
    %39 = arith.select %37, %38, %29 : vector<3x16x16xi1>, vector<3x16x16xf32>
    %cst_14 = arith.constant dense<0.000000e+00> : vector<3x16xf32>
    %40 = vector.multi_reduction <add>, %39, %cst_14 [1] : vector<3x16x16xf32> to vector<3x16xf32>
    %41 = vector.shape_cast %40 : vector<3x16xf32> to vector<3x1x16xf32>
    %cst_15 = arith.constant 9.99999993E-9 : f32
    %42 = vector.broadcast %cst_15 : f32 to vector<3x1x16xf32>
    %43 = arith.addf %41, %42 : vector<3x1x16xf32>
    %44 = tpu.reciprocal %43 : vector<3x1x16xf32> -> vector<3x1x16xf32>
    %45 = vector.broadcast %44 : vector<3x1x16xf32> to vector<3x16x16xf32>
    %46 = arith.mulf %39, %45 : vector<3x16x16xf32>
    %c0_16 = arith.constant 0 : index
    %c0_17 = arith.constant 0 : index
    %c0_18 = arith.constant 0 : index
    %47 = vector.load %arg2[%c0_16, %c0_17, %c0_18] : memref<3x1x1xf32, #tpu.memory_space<vmem>>, vector<3x1x1xf32>
    %48 = vector.broadcast %47 : vector<3x1x1xf32> to vector<3x16x16xf32>
    %49 = arith.mulf %48, %46 : vector<3x16x16xf32>
    %cst_19 = arith.constant dense<0.000000e+00> : vector<16x16xf32>
    %50 = vector.multi_reduction <add>, %49, %cst_19 [0] : vector<3x16x16xf32> to vector<16x16xf32>
    %c0_20 = arith.constant 0 : index
    %c0_21 = arith.constant 0 : index
    %51 = vector.load %arg7[%c0_20, %c0_21] : memref<16x16xf32, #tpu.memory_space<vmem>>, vector<16x16xf32>
    tpu.vector_store %arg7[%c0_20, %c0_21], %50 {strides = array<i32>} : memref<16x16xf32, #tpu.memory_space<vmem>>, vector<16x16xf32>,
    %c0_22 = arith.constant 0 : index
    %c0_23 = arith.constant 0 : index
    %52 = vector.load %arg3[%c0_22, %c0_23] : memref<16x128xf32, #tpu.memory_space<vmem>>, vector<16x128xf32>
    %cst_24 = arith.constant dense<0.000000e+00> : vector<16x128xf32>
    %53 = tpu.matmul %50, %52, %cst_24 {dimension_numbers = #tpu.dot_dimension_numbers<[1], [0], [0], [1], [0, 0, 1, 1], [], []>, precision = #tpu.contract_precision<fp32>} : vector<16x16xf32>, vector<16x128xf32>, vector<16x128xf32> -> vector<16x128xf32>
    %c0_25 = arith.constant 0 : index
    %c0_26 = arith.constant 0 : index
    %54 = vector.load %arg4[%c0_25, %c0_26] : memref<128x128xf32, #tpu.memory_space<vmem>>, vector<128x128xf32>
    %cst_27 = arith.constant dense<0.000000e+00> : vector<16x128xf32>
    %55 = tpu.matmul %53, %54, %cst_27 {dimension_numbers = #tpu.dot_dimension_numbers<[1], [0], [0], [1], [0, 0, 1, 1], [], []>, precision = #tpu.contract_precision<fp32>} : vector<16x128xf32>, vector<128x128xf32>, vector<16x128xf32> -> vector<16x128xf32>
    %cst_28 = arith.constant 0.000000e+00 : f32
    %56 = vector.broadcast %cst_28 : f32 to vector<16x128xf32>
    %57 = arith.maximumf %55, %56 : vector<16x128xf32>
    %cst_29 = arith.constant dense<0.000000e+00> : vector<16x128xf32>
    %58 = tpu.matmul %50, %57, %cst_29 {dimension_numbers = #tpu.dot_dimension_numbers<[1], [0], [0], [1], [0, 0, 1, 1], [], []>, precision = #tpu.contract_precision<fp32>} : vector<16x16xf32>, vector<16x128xf32>, vector<16x128xf32> -> vector<16x128xf32>
    %c0_30 = arith.constant 0 : index
    %c0_31 = arith.constant 0 : index
    %59 = vector.load %arg5[%c0_30, %c0_31] : memref<128x128xf32, #tpu.memory_space<vmem>>, vector<128x128xf32>
    %cst_32 = arith.constant dense<0.000000e+00> : vector<16x128xf32>
    %60 = tpu.matmul %58, %59, %cst_32 {dimension_numbers = #tpu.dot_dimension_numbers<[1], [0], [0], [1], [0, 0, 1, 1], [], []>, precision = #tpu.contract_precision<fp32>} : vector<16x128xf32>, vector<128x128xf32>, vector<16x128xf32> -> vector<16x128xf32>
    %cst_33 = arith.constant 0.000000e+00 : f32
    %61 = vector.broadcast %cst_33 : f32 to vector<16x128xf32>
    %62 = arith.maximumf %60, %61 : vector<16x128xf32>
    %c0_34 = arith.constant 0 : index
    %c0_35 = arith.constant 0 : index
    %63 = vector.load %arg6[%c0_34, %c0_35] : memref<16x128xf32, #tpu.memory_space<vmem>>, vector<16x128xf32>
    tpu.vector_store %arg6[%c0_34, %c0_35], %62 {strides = array<i32>} : memref<16x128xf32, #tpu.memory_space<vmem>>, vector<16x128xf32>,
    return
  }
}

</mosaic_0001>

<bundles_post_ra>
// kernel: tpu_custom_call.1
= control target key start
LH: loop header
LB: loop body
LE: loop exit
PB: predicated region body
PF: predicated region fallthrough
CT: control target
= control target key end

     0   :  { %13 = vsyncpa [#allocation3], 0  ;;  %s2714_s0 = inlined_call_operand.hbm [shape: f32[3,16,16], index: 0, kind: input, shape index: {}]   ;;  %s2715_s1 = inlined_call_operand.vmem [shape: f32[3,1,16], index: 1, kind: input, shape index: {}]   ;;  %s2716_s2 = inlined_call_operand.vmem [shape: f32[3,1,1], index: 2, kind: input, shape index: {}]   ;;  %s2717_s3 = inlined_call_operand.hbm [shape: f32[16,128], index: 3, kind: input, shape index: {}]   ;;  %s2718_s4 = inlined_call_operand.hbm [shape: f32[128,128], index: 4, kind: input, shape index: {}]   ;;  %s2719_s5 = inlined_call_operand.hbm [shape: f32[128,128], index: 5, kind: input, shape index: {}]   ;;  %s2720_s6 = inlined_call_operand.hbm [shape: f32[16,128], index: 6, kind: output, shape index: {0}]   ;;  %s2721_s7 = inlined_call_operand.hbm [shape: f32[16,16], index: 7, kind: output, shape index: {1}]  }
   0x1   :  { %14 = vsyncpa [#allocation6], 0 }
   0x2   :  { %15 = vsyncpa [#allocation9], 0 }
   0x3   :  { %16 = vsyncpa [#allocation4], 0 }
   0x4   :  { %17 = vsyncpa [#allocation12], 0  ;;  %s39_s26 = sshll.u32 %s2717_s3, 4  ;;  %s1893_s27 = smov [#allocation5]   ;;  %s40_s26 = int_to_ptr.hbm [resolvable:$true] %s39_s26 }
   0x5   :  { %s41_s28 = sshll.u32 %s1893_s27, 4  ;;  %s22_s8 = sshll.u32 %s2714_s0, 4  ;;  %s42_s28 = int_to_ptr.vmem [resolvable:$true] %s41_s28  ;;  %s23_s8 = int_to_ptr.hbm [resolvable:$true] %s22_s8 }
   0x6   :  { %s1894_s9 = smov 128   ;;  %s1895_s10 = smov 8  }
   0x7   :  { %47 = dma.hbm_to_vmem [thread:$0]  %s40_s26, 256, %s42_s28, [#allocation6], %s1894_s9, %s1894_s9, %s1895_s10  }
   0x8   :  { %s1896_s11 = smov [#allocation2]   ;;  %s52_s3 = sshll.u32 %s2718_s4, 4  ;;  %s53_s3 = int_to_ptr.hbm [resolvable:$true] %s52_s3 }
   0x9   :  { %s24_s12 = sshll.u32 %s1896_s11, 4  ;;  %s65_s16 = sshll.u32 %s2719_s5, 4  ;;  %s25_s12 = int_to_ptr.vmem [resolvable:$true] %s24_s12  ;;  %s66_s16 = int_to_ptr.hbm [resolvable:$true] %s65_s16 }
   0xa   :  { %30 = dma.hbm_to_vmem [thread:$0]  %s23_s8, 768, %s25_s12, [#allocation3], %s1894_s9, %s1894_s9, %s1895_s10  }
   0xb   :  { %s1897_s17 = smov [#allocation7]   ;;  %s1898_s19 = smov [#allocation8]  }
   0xc   :  { %s54_s18 = sshll.u32 %s1897_s17, 4  ;;  %s67_s4 = sshll.u32 %s1898_s19, 4  ;;  %s55_s18 = int_to_ptr.vmem [resolvable:$true] %s54_s18  ;;  %s68_s4 = int_to_ptr.vmem [resolvable:$true] %s67_s4 }
   0xd   :  { %60 = dma.hbm_to_vmem [thread:$0]  %s53_s3, 2048, %s55_s18, [#allocation6], %s1894_s9, %s1894_s9, %s1895_s10  }
   0xe   :  { %73 = dma.hbm_to_vmem [thread:$0]  %s66_s16, 2048, %s68_s4, [#allocation9], %s1894_s9, %s1894_s9, %s1895_s10  }
   0xf   :  { %1883 = dma.done.wait [#allocation3], 768  }
  0x10   :  { %1884 = vsyncadd [#allocation3], 4294966528 }
  0x11   :  { %1885 = dma.done.wait [#allocation6], 2304  }
  0x12   :  { %1886 = vsyncadd [#allocation6], 4294964992 }
  0x13   :  { %1887 = dma.done.wait [#allocation9], 2048  }
  0x14   :  { %1888 = vsyncadd [#allocation9], 4294965248  ;;  %v1899_v0 = vmov 0   ;;  %v1688_v1 = vld [vmem:[%s2716_s2] ss:$0 sm:$0xff]  ;;  %v315_v62 = vlaneseq  ;;  %s1651_s12 = sshll.u32 %s2721_s7, 4  ;;  %s1652_s12 = int_to_ptr.hbm [resolvable:$true] %s1651_s12 }
  0x15   :  { %1686 = vset.pattern.permute.xlu0 %v1899_v0  ;;  %1687 = vset.pattern.permute.xlu1 %v1899_v0  ;;  %v1690_v2 = vld [vmem:[%s2716_s2 + $0x2] ss:$0 sm:$0xff]  ;;  %v90_v3 = vld [vmem:[%s2715_s1] sm:$0x1]  ;;  %v91_v4 = vld [vmem:[%s2715_s1 + $0x1] sm:$0x1] }
  0x16   :  { %433 = vperm.xlu0 %1686, %v1688_v1   ;;  %v92_v5 = vld [vmem:[%s2715_s1 + $0x2] sm:$0x1]  ;;  %441 = vperm.xlu1 %1687, %v1690_v2   ;;  %v1671_v6 = vmul.f32 -5.0, %v90_v3  ;;  %v1672_v7 = vmul.f32 -5.0, %v91_v4  ;;  %v1689_v12 = vld [vmem:[%s2716_s2 + $0x1] ss:$0 sm:$0xff] }
  0x17   :  { %v1673_v8 = vmul.f32 -5.0, %v92_v5  ;;  %v1993_v4 = vshrl.u32 %v315_v62, 7  ;;  %s1900_s1 = smov [#allocation11]   ;;  %s1901_s7 = smov [#allocation10]  }
  0x18   :  { %v99_v9 = vmul.f32 1.442695, %v1671_v6  ;;  %v101_v10 = vmul.f32 1.442695, %v1672_v7  ;;  %v1997_v7 = vld [vmem:[#allocation2] sm:$0xff]  ;;  %s1649_s2 = sshll.u32 %s1900_s1, 4  ;;  %s1650_s2 = int_to_ptr.vmem [resolvable:$true] %s1649_s2 }
  0x19   :  { %v103_v11 = vmul.f32 1.442695, %v1673_v8  ;;  %v1999_v8 = vld [vmem:[#allocation2 + $0x8] sm:$0xff]  ;;  %s1636_s13 = sshll.u32 %s1901_s7, 4  ;;  %s1638_s0 = sshll.u32 %s2720_s6, 4  ;;  %s1637_s13 = int_to_ptr.vmem [resolvable:$true] %s1636_s13  ;;  %s1639_s0 = int_to_ptr.hbm [resolvable:$true] %s1638_s0 }
  0x1a   :  { %1691 = vpow2.f32 %v99_v9 }
  0x1b   :  { %1693 = vpow2.f32 %v101_v10  ;;  %v2001_v10 = vld [vmem:[#allocation2 + $0x10] sm:$0xff] }
  0x1c   :  { %1695 = vpow2.f32 %v103_v11  ;;  %v2003_v11 = vld [vmem:[#allocation2 + $0x18] sm:$0xff] }
  0x1e   :  { %437 = vperm.xlu0 %1686, %v1689_v12   ;;  %v2005_v12 = vld [vmem:[#allocation2 + $0x20] sm:$0xff] }
  0x20   :  { %v1692_v13 = vpop.eup %1691 }
  0x21   :  { %v1694_v14 = vpop.eup %1693  ;;  %v105_v15 = vadd.f32 1.0, %v1692_v13  ;;  %v2007_v13 = vand.u32 127, %v315_v62 }
  0x22   :  { %v1696_v16 = vpop.eup %1695  ;;  %v106_v17 = vadd.f32 1.0, %v1694_v14  ;;  %v2010_v14 = vadd.s32 8, %v1993_v4 }
  0x23   :  { %1697 = vrcp.f32 %v105_v15  ;;  %v107_v18 = vadd.f32 1.0, %v1696_v16  ;;  %v117_v22 = vand.u32 2147483647, %v105_v15  ;;  %v119_v23 = vand.u32 2147483648, %v105_v15 }
  0x24   :  { %1699 = vrcp.f32 %v106_v17  ;;  %v134_v25 = vand.u32 2147483648, %v106_v17  ;;  %vm113_vm0 = vweird.f32 %v105_v15  ;;  %vm128_vm2 = vweird.f32 %v106_v17 }
  0x25   :  { %1701 = vrcp.f32 %v107_v18  ;;  %v132_v29 = vand.u32 2147483647, %v106_v17  ;;  %vm1984_vm4 = vcmp.eq.f32.partialorder %v117_v22, 8.507059e+37  ;;  %v120_v32 = vor.u32 1.1754944e-38, %v119_v23 }
  0x26   :  { %v135_v35 = vor.u32 1.1754944e-38, %v134_v25  ;;  %vm143_vm6 = vweird.f32 %v107_v18  ;;  %v149_v36 = vand.u32 2147483648, %v107_v18  ;;  %v147_v39 = vand.u32 2147483647, %v107_v18 }
  0x27   :  { %vm133_vm9 = vcmp.eq.f32.partialorder %v132_v29, 8.507059e+37  ;;  %v268_v16 = vsub.f32 0.0, %v1999_v8 }
  0x28   :  { %v150_v45 = vor.u32 1.1754944e-38, %v149_v36  ;;  %vm148_vm11 = vcmp.eq.f32.partialorder %v147_v39, 8.507059e+37 }
  0x29   :  { %v1698_v19 = vpop.eup %1697 }
  0x2a   :  { %v1700_v20 = vpop.eup %1699  ;;  %v109_v21 = vmul.f32 %v1698_v19, %v105_v15  ;;  %vm114_vm1 = vweird.f32 %v1698_v19  ;;  %v267_v15 = vsub.f32 0.0, %v1997_v7 }
  0x2b   :  { %v124_v24 = vmul.f32 %v1700_v20, %v106_v17  ;;  %v1702_v27 = vpop.eup %1701  ;;  %vm129_vm3 = vweird.f32 %v1700_v20  ;;  %vm115_vm5 = vmor %vm113_vm0, %vm114_vm1 }
  0x2c   :  { %v110_v26 = vsub.f32 1.0, %v109_v21  ;;  %v139_v33 = vmul.f32 %v1702_v27, %v107_v18  ;;  %vm130_vm7 = vmor %vm128_vm2, %vm129_vm3  ;;  %vm144_vm8 = vweird.f32 %v1702_v27  ;;  %v269_v18 = vsub.f32 0.0, %v2001_v10 }
  0x2d   :  { %v125_v28 = vsub.f32 1.0, %v124_v24  ;;  %vm145_vm10 = vmor %vm143_vm6, %vm144_vm8  ;;  %v271_v21 = vsub.f32 0.0, %v2005_v12 }
  0x2e   :  { %v111_v30 = vmul.f32 %v1698_v19, %v110_v26  ;;  %v140_v38 = vsub.f32 1.0, %v139_v33 }
  0x2f   :  { %v126_v34 = vmul.f32 %v1700_v20, %v125_v28 }
  0x30   :  { %v112_v37 = vadd.f32 %v1698_v19, %v111_v30  ;;  %v141_v42 = vmul.f32 %v1702_v27, %v140_v38 }
  0x31   :  { %v127_v40 = vadd.f32 %v1700_v20, %v126_v34 }
  0x32   :  { %v116_v41 = vsel %vm115_vm5, %v1698_v19, %v112_v37  ;;  %v142_v48 = vadd.f32 %v1702_v27, %v141_v42  ;;  %v270_v19 = vsub.f32 0.0, %v2003_v11 }
  0x33   :  { %v121_v43 = vsel %vm1984_vm4, %v120_v32, %v116_v41  ;;  %v131_v44 = vsel %vm130_vm7, %v1700_v20, %v127_v40 }
  0x34   :  { %v153_v46 = vadd.f32 1e-05, %v121_v43  ;;  %v136_v47 = vsel %vm133_vm9, %v135_v35, %v131_v44  ;;  %v146_v51 = vsel %vm145_vm10, %v1702_v27, %v142_v48 }
  0x35   :  { %v154_v49 = vadd.f32 1e-05, %v136_v47  ;;  %v151_v53 = vsel %vm148_vm11, %v150_v45, %v146_v51 }
  0x36   :  { %v156_v50 = vmul.f32 1.0986123, %v153_v46  ;;  %v155_v55 = vadd.f32 1e-05, %v151_v53 }
  0x37   :  { %v157_v52 = vmul.f32 1.0986123, %v154_v49 }
  0x38   :  { %v159_v54 = vmul.f32 1.442695, %v156_v50  ;;  %v158_v57 = vmul.f32 1.0986123, %v155_v55 }
  0x39   :  { %v161_v56 = vmul.f32 1.442695, %v157_v52 }
  0x3a   :  { %1703 = vpow2.f32 %v159_v54  ;;  %v163_v58 = vmul.f32 1.442695, %v158_v57 }
  0x3b   :  { %1705 = vpow2.f32 %v161_v56 }
  0x3c   :  { %1707 = vpow2.f32 %v163_v58 }
  0x40   :  { %v1704_v59 = vpop.eup %1703 }
  0x41   :  { %v1706_v60 = vpop.eup %1705  ;;  %v1674_v61 = vadd.f32 -1.0, %v1704_v59 }
  0x42   :  { %v1675_v63 = vadd.f32 -1.0, %v1706_v60  ;;  %v1708_v9 = vpop.eup %1707 }
  0x43   :  { %v168_v0 = vmul.f32 2.0, %v1674_v61  ;;  %v1990_v1 = vmul.f32 2.5066283, %v1674_v61  ;;  %v1676_v20 = vadd.f32 -1.0, %v1708_v9 }
  0x44   :  { %v169_v2 = vmul.f32 2.0, %v1675_v63  ;;  %v1995_v6 = vmul.f32 2.5066283, %v1675_v63 }
  0x45   :  { %v171_v3 = vmul.f32 %v1674_v61, %v168_v0  ;;  %1709 = vrcp.f32 %v1990_v1  ;;  %v228_v23 = vand.u32 2147483647, %v1990_v1  ;;  %v230_v24 = vand.u32 2147483648, %v1990_v1 }
  0x46   :  { %v172_v5 = vmul.f32 %v1675_v63, %v169_v2  ;;  %vm224_vm13 = vweird.f32 %v1990_v1  ;;  %v170_v28 = vmul.f32 2.0, %v1676_v20  ;;  %v2025_v29 = vmul.f32 2.5066283, %v1676_v20 }
  0x47   :  { %1711 = vrcp.f32 %v171_v3  ;;  %vm179_vm12 = vweird.f32 %v171_v3  ;;  %v183_v26 = vand.u32 2147483647, %v171_v3  ;;  %v185_v27 = vand.u32 2147483648, %v171_v3 }
  0x48   :  { %1713 = vrcp.f32 %v172_v5  ;;  %vm193_vm14 = vweird.f32 %v172_v5  ;;  %v197_v32 = vand.u32 2147483647, %v172_v5  ;;  %v199_v33 = vand.u32 2147483648, %v172_v5 }
  0x49   :  { %1715 = vrcp.f32 %v1995_v6  ;;  %v2027_v36 = vmul.f32 %v1676_v20, %v170_v28  ;;  %v242_v39 = vand.u32 2147483647, %v1995_v6  ;;  %v244_v40 = vand.u32 2147483648, %v1995_v6 }
  0x4a   :  { %1717 = vrcp.f32 %v2025_v29  ;;  %vm2037_vm1 = vcmp.eq.f32.partialorder %v183_v26, 8.507059e+37  ;;  %v186_v45 = vor.u32 1.1754944e-38, %v185_v27  ;;  %v231_v46 = vor.u32 1.1754944e-38, %v230_v24 }
  0x4b   :  { %v2015_v17 = vpop.eup %1709  ;;  %1719 = vrcp.f32 %v2027_v36  ;;  %vm2047_vm3 = vcmp.eq.f32.partialorder %v228_v23, 8.507059e+37  ;;  %vm238_vm4 = vweird.f32 %v1995_v6  ;;  %vm2059_vm7 = vcmp.eq.f32.partialorder %v197_v32, 8.507059e+37 }
  0x4c   :  { %v220_v22 = vmul.f32 %v2015_v17, %v1990_v1  ;;  %vm225_vm5 = vweird.f32 %v2015_v17  ;;  %v200_v55 = vor.u32 1.1754944e-38, %v199_v33  ;;  %vm2066_vm8 = vcmp.eq.f32.partialorder %v242_v39, 8.507059e+37  ;;  %v2122_v39 = vld [vmem:[#allocation2 + $0x28] sm:$0xff] }
  0x4d   :  { %v1712_v25 = vpop.eup %1711  ;;  %v245_v60 = vor.u32 1.1754944e-38, %v244_v40  ;;  %vm252_vm10 = vweird.f32 %v2025_v29  ;;  %vm2086_vm11 = vmor %vm224_vm13, %vm225_vm5  ;;  %v213_v1 = vand.u32 2147483648, %v2027_v36  ;;  %v256_v44 = vand.u32 2147483647, %v2025_v29 }
  0x4e   :  { %v1714_v30 = vpop.eup %1713  ;;  %v175_v31 = vmul.f32 %v1712_v25, %v171_v3  ;;  %v221_v34 = vsub.f32 1.0, %v220_v22  ;;  %vm180_vm15 = vweird.f32 %v1712_v25  ;;  %vm321_vm5 = vcmp.ne.s32.totalorder %v2010_v14, %v2007_v13 }
  0x4f   :  { %v189_v35 = vmul.f32 %v1714_v30, %v172_v5  ;;  %v2030_v37 = vpop.eup %1715  ;;  %vm194_vm0 = vweird.f32 %v1714_v30  ;;  %vm2042_vm2 = vmor %vm179_vm12, %vm180_vm15  ;;  %v211_v5 = vand.u32 2147483647, %v2027_v36  ;;  %vm207_vm12 = vweird.f32 %v2027_v36 }
  0x50   :  { %v176_v38 = vsub.f32 1.0, %v175_v31  ;;  %v234_v42 = vmul.f32 %v2030_v37, %v1995_v6  ;;  %v222_v48 = vmul.f32 %v2015_v17, %v221_v34  ;;  %vm2055_vm6 = vmor %vm193_vm14, %vm194_vm0  ;;  %v2063_v56 = vpop.eup %1717  ;;  %vm239_vm9 = vweird.f32 %v2030_v37 }
  0x51   :  { %v190_v41 = vsub.f32 1.0, %v189_v35  ;;  %v248_v62 = vmul.f32 %v2063_v56, %v2025_v29  ;;  %v1720_v63 = vpop.eup %1719  ;;  %vm320_vm14 = vcmp.ne.s32.totalorder %v1993_v4, %v2007_v13  ;;  %vm2106_vm13 = vmor %vm238_vm4, %vm239_vm9  ;;  %vm2117_vm0 = vcmp.eq.f32.partialorder %v211_v5, 8.507059e+37  ;;  %v463_v13 = vld [vmem:[#allocation5 + $0x8] sm:$0xff] }
  0x52   :  { %v177_v43 = vmul.f32 %v1712_v25, %v176_v38  ;;  %v235_v51 = vsub.f32 1.0, %v234_v42  ;;  %v223_v2 = vadd.f32 %v2015_v17, %v222_v48  ;;  %v203_v23 = vmul.f32 %v1720_v63, %v2027_v36 }
  0x53   :  { %v191_v50 = vmul.f32 %v1714_v30, %v190_v41  ;;  %v249_v26 = vsub.f32 1.0, %v248_v62  ;;  %vm208_vm15 = vweird.f32 %v1720_v63  ;;  %v214_v41 = vor.u32 1.1754944e-38, %v213_v1 }
  0x54   :  { %v178_v52 = vadd.f32 %v1712_v25, %v177_v43  ;;  %v236_v58 = vmul.f32 %v2030_v37, %v235_v51  ;;  %v204_v31 = vsub.f32 1.0, %v203_v23  ;;  %v227_v32 = vsel %vm2086_vm11, %v2015_v17, %v223_v2 }
  0x55   :  { %v192_v57 = vadd.f32 %v1714_v30, %v191_v50  ;;  %v250_v38 = vmul.f32 %v2063_v56, %v249_v26  ;;  %v232_v42 = vsel %vm2047_vm3, %v231_v46, %v227_v32  ;;  %vm322_vm3 = vcmp.eq.f32.partialorder %v1997_v7, 0.0 }
  0x56   :  { %v182_v61 = vsel %vm2042_vm2, %v1712_v25, %v178_v52  ;;  %v237_v24 = vadd.f32 %v2030_v37, %v236_v58  ;;  %v205_v35 = vmul.f32 %v1720_v63, %v204_v31  ;;  %vm253_vm2 = vweird.f32 %v2063_v56  ;;  %vm332_vm9 = vmand %vm322_vm3, %vm320_vm14 }
  0x57   :  { %v187_v0 = vsel %vm2037_vm1, %v186_v45, %v182_v61  ;;  %v196_v3 = vsel %vm2055_vm6, %v1714_v30, %v192_v57  ;;  %vm2129_vm1 = vmor %vm207_vm12, %vm208_vm15  ;;  %v272_v45 = vsub.f32 0.0, %v2122_v39  ;;  %v251_v46 = vadd.f32 %v2063_v56, %v250_v38 }
  0x58   :  { %v276_v20 = vperm.slane %v187_v0, 0  ;;  %v201_v22 = vsel %vm2059_vm7, %v200_v55, %v196_v3  ;;  %v241_v17 = vsel %vm2106_vm13, %v2030_v37, %v237_v24  ;;  %v206_v43 = vadd.f32 %v1720_v63, %v205_v35  ;;  %vm2149_vm4 = vmor %vm252_vm10, %vm253_vm2 }
  0x59   :  { %v277_v25 = vperm.slane %v201_v22, 0  ;;  %v258_v37 = vand.u32 2147483648, %v2025_v29  ;;  %v246_v36 = vsel %vm2066_vm8, %v245_v60, %v241_v17  ;;  %v303_v48 = vperm.slane %v232_v42, 0 }
  0x5a   :  { %v282_v27 = vmul.f32 %v276_v20, %v267_v15  ;;  %v283_v28 = vmul.f32 %v276_v20, %v268_v16  ;;  %v210_v47 = vsel %vm2129_vm1, %v1720_v63, %v206_v43  ;;  %vm323_vm6 = vcmp.eq.f32.partialorder %v1999_v8, 0.0 }
  0x5b   :  { %v284_v15 = vmul.f32 %v277_v25, %v269_v18  ;;  %v285_v16 = vmul.f32 %v277_v25, %v270_v19  ;;  %v215_v49 = vsel %vm2117_vm0, %v214_v41, %v210_v47  ;;  %v304_v52 = vperm.slane %v246_v36, 0  ;;  %vm333_vm12 = vmand %vm323_vm6, %vm321_vm5  ;;  %v462_v41 = vld [vmem:[#allocation5] sm:$0xff] }
  0x5c   :  { %v288_v6 = vmul.f32 1.442695, %v282_v27  ;;  %v290_v34 = vmul.f32 1.442695, %v283_v28  ;;  %v278_v51 = vperm.slane %v215_v49, 0  ;;  %vm324_vm7 = vcmp.eq.f32.partialorder %v2001_v10, 0.0 }
  0x5d   :  { %v292_v40 = vmul.f32 1.442695, %v284_v15  ;;  %v294_v18 = vmul.f32 1.442695, %v285_v16  ;;  %vm325_vm8 = vcmp.eq.f32.partialorder %v2003_v11, 0.0  ;;  %v259_v7 = vor.u32 1.1754944e-38, %v258_v37  ;;  %vm334_vm13 = vmand %vm324_vm7, %vm320_vm14 }
  0x5e   :  { %1721 = vpow2.f32 %v288_v6  ;;  %v255_v29 = vsel %vm2149_vm4, %v2063_v56, %v251_v46  ;;  %vm2164_vm10 = vcmp.eq.f32.partialorder %v256_v44, 8.507059e+37  ;;  %v286_v55 = vmul.f32 %v278_v51, %v271_v21  ;;  %vm335_vm15 = vmand %vm325_vm8, %vm321_vm5 }
  0x5f   :  { %1723 = vpow2.f32 %v290_v34  ;;  %v287_v57 = vmul.f32 %v278_v51, %v272_v45  ;;  %vm344_vm11 = vcmask 130048   ;;  %v260_v8 = vsel %vm2164_vm10, %v259_v7, %v255_v29 }
  0x60   :  { %1725 = vpow2.f32 %v292_v40  ;;  %v296_v56 = vmul.f32 1.442695, %v286_v55  ;;  %v305_v24 = vperm.slane %v260_v8, 0  ;;  %vm326_vm0 = vcmp.eq.f32.partialorder %v2005_v12, 0.0 }
  0x61   :  { %1727 = vpow2.f32 %v294_v18  ;;  %v298_v21 = vmul.f32 1.442695, %v287_v57  ;;  %vm327_vm1 = vcmp.eq.f32.partialorder %v2122_v39, 0.0  ;;  %vm336_vm2 = vmand %vm326_vm0, %vm320_vm14  ;;  %v484_v14 = vand.u32 4294901760, %v463_v13 }
  0x62   :  { %1729 = vpow2.f32 %v296_v56  ;;  %vm337_vm3 = vmand %vm327_vm1, %vm321_vm5  ;;  %v486_v43 = vand.u32 4294901760, %v462_v41 }
  0x63   :  { %1731 = vpow2.f32 %v298_v21  ;;  %v520_v42 = vsub.f32 %v463_v13, %v484_v14  ;;  %648 = vmatpush.msra.mxu1 %v484_v14  ;;  %485 = vmatpush.msra.mxu2 %v484_v14 }
  0x64   :  { %v1722_v53 = vpop.eup %1721  ;;  %v526_v47 = vsub.f32 %v462_v41, %v486_v43 }
  0x65   :  { %v1724_v58 = vpop.eup %1723  ;;  %v309_v59 = vmul.f32 %v1722_v53, %v303_v48  ;;  %v521_v36 = vand.u32 4294901760, %v520_v42  ;;  %650 = vmatpush.msra.mxu1 %v486_v43  ;;  %487 = vmatpush.msra.mxu2 %v486_v43 }
  0x66   :  { %v1726_v60 = vpop.eup %1725  ;;  %v310_v61 = vmul.f32 %v1724_v58, %v303_v48  ;;  %v527_v50 = vand.u32 4294901760, %v526_v47 }
  0x67   :  { %v1728_v62 = vpop.eup %1727  ;;  %v2180_v63 = vsel %vm332_vm9, 0.0, %v309_v59  ;;  %v311_v0 = vmul.f32 %v1726_v60, %v304_v52  ;;  %556 = vmatpush.msrb.mxu2 %v520_v42  ;;  %v522_v49 = vsub.f32 %v520_v42, %v521_v36  ;;  %619 = vmatpush.msra.mxu0 %v521_v36 }
  0x68   :  { %v2189_v2 = vsel %vm333_vm12, 0.0, %v310_v61  ;;  %v345_v10 = vsel %vm344_vm11, %v2180_v63, 0.0  ;;  %v312_v3 = vmul.f32 %v1728_v62, %v304_v52  ;;  %v1730_v26 = vpop.eup %1729  ;;  %v528_v7 = vsub.f32 %v526_v47, %v527_v50 }
  0x69   :  { %v346_v5 = vsel %vm344_vm11, %v2189_v2, 0.0  ;;  %v2195_v9 = vsel %vm334_vm13, 0.0, %v311_v0  ;;  %v1732_v30 = vpop.eup %1731  ;;  %v313_v31 = vmul.f32 %v1730_v26, %v305_v24  ;;  %559 = vmatpush.msrb.mxu2 %v526_v47  ;;  %623 = vmatpush.msra.mxu0 %v527_v50  ;;  %v523_v52 = vand.u32 4294901760, %v522_v49 }
  0x6a   :  { %v347_v20 = vadd.f32 %v346_v5, %v345_v10  ;;  %v2197_v22 = vsel %vm335_vm15, 0.0, %v312_v3  ;;  %v354_v11 = vsel %vm344_vm11, %v2195_v9, 0.0  ;;  %v314_v12 = vmul.f32 %v1732_v30, %v305_v24 }
  0x6b   :  { %v355_v23 = vsel %vm344_vm11, %v2197_v22, 0.0  ;;  %v2211_v16 = vsel %vm336_vm2, 0.0, %v313_v31  ;;  %524 = vmatpush.msra.mxu3 %v523_v52  ;;  %v529_v54 = vand.u32 4294901760, %v528_v7 }
  0x6c   :  { %v348_v25 = vrot.slane %v347_v20, 4  ;;  %v356_v1 = vadd.f32 %v355_v23, %v354_v11  ;;  %v2213_v34 = vsel %vm337_vm3, 0.0, %v314_v12  ;;  %v363_v35 = vsel %vm344_vm11, %v2211_v16, 0.0 }
  0x6d   :  { %v364_v4 = vsel %vm344_vm11, %v2213_v34, 0.0  ;;  %530 = vmatpush.msra.mxu3 %v529_v54  ;;  %v674_v54 = vld [vmem:[#allocation7 + $0x70] sm:$0xff] }
  0x6e   :  { %v349_v27 = vadd.f32 %v348_v25, %v347_v20  ;;  %v357_v28 = vrot.slane %v356_v1, 4  ;;  %v365_v17 = vadd.f32 %v364_v4, %v363_v35 }
  0x6f   :  { %586 = vmatpush.msrb.mxu3 %v484_v14 }
  0x70   :  { %v350_v32 = vrot.slane %v349_v27, 2  ;;  %v358_v15 = vadd.f32 %v357_v28, %v356_v1  ;;  %v366_v19 = vrot.slane %v365_v17, 4 }
  0x71   :  { %588 = vmatpush.msrb.mxu3 %v486_v43 }
  0x72   :  { %v351_v33 = vadd.f32 %v350_v32, %v349_v27  ;;  %v359_v6 = vrot.slane %v358_v15, 2  ;;  %v367_v45 = vadd.f32 %v366_v19, %v365_v17 }
  0x74   :  { %v352_v38 = vrot.slane %v351_v33, 1  ;;  %v360_v39 = vadd.f32 %v359_v6, %v358_v15  ;;  %v368_v48 = vrot.slane %v367_v45, 2 }
  0x76   :  { %v353_v40 = vadd.f32 %v352_v38, %v351_v33  ;;  %v361_v18 = vrot.slane %v360_v39, 1  ;;  %v369_v51 = vadd.f32 %v368_v48, %v367_v45 }
  0x78   :  { %v372_v44 = vadd.f32 1e-08, %v353_v40  ;;  %v362_v37 = vadd.f32 %v361_v18, %v360_v39  ;;  %v370_v29 = vrot.slane %v369_v51, 1 }
  0x7a   :  { %1733 = vrcp.f32 %v372_v44  ;;  %v373_v46 = vadd.f32 1e-08, %v362_v37  ;;  %v371_v57 = vadd.f32 %v370_v29, %v369_v51  ;;  %vm380_vm14 = vweird.f32 %v372_v44  ;;  %v675_v29 = vld [vmem:[#allocation7 + $0x78] sm:$0xff] }
  0x7b   :  { %v386_v60 = vand.u32 2147483648, %v372_v44  ;;  %v384_v62 = vand.u32 2147483647, %v372_v44 }
  0x7c   :  { %1735 = vrcp.f32 %v373_v46  ;;  %v374_v56 = vadd.f32 1e-08, %v371_v57  ;;  %vm394_vm5 = vweird.f32 %v373_v46  ;;  %v400_v0 = vand.u32 2147483648, %v373_v46 }
  0x7d   :  { %v398_v3 = vand.u32 2147483647, %v373_v46  ;;  %v387_v11 = vor.u32 1.1754944e-38, %v386_v60  ;;  %vm385_vm8 = vcmp.eq.f32.partialorder %v384_v62, 8.507059e+37  ;;  %v2251_v57 = vand.u32 4294901760, %v675_v29 }
  0x7e   :  { %1737 = vrcp.f32 %v374_v56  ;;  %v401_v25 = vor.u32 1.1754944e-38, %v400_v0  ;;  %vm408_vm12 = vweird.f32 %v374_v56  ;;  %v412_v12 = vand.u32 2147483647, %v374_v56 }
  0x7f   :  { %vm399_vm10 = vcmp.eq.f32.partialorder %v398_v3, 8.507059e+37  ;;  %v414_v33 = vand.u32 2147483648, %v374_v56  ;;  %890 = vmatpush.msrb.mxu1 %v2251_v57 }
  0x80   :  { %v1734_v53 = vpop.eup %1733  ;;  %vm413_vm0 = vcmp.eq.f32.partialorder %v412_v12, 8.507059e+37 }
  0x81   :  { %v376_v55 = vmul.f32 %v1734_v53, %v372_v44  ;;  %vm381_vm4 = vweird.f32 %v1734_v53  ;;  %v415_v14 = vor.u32 1.1754944e-38, %v414_v33  ;;  %v670_v33 = vld [vmem:[#allocation7 + $0x50] sm:$0xff] }
  0x82   :  { %v1736_v58 = vpop.eup %1735  ;;  %vm2219_vm6 = vmor %vm380_vm14, %vm381_vm4 }
  0x83   :  { %v377_v59 = vsub.f32 1.0, %v376_v55  ;;  %v390_v61 = vmul.f32 %v1736_v58, %v373_v46  ;;  %vm395_vm7 = vweird.f32 %v1736_v58  ;;  %v673_v55 = vld [vmem:[#allocation7 + $0x68] sm:$0xff] }
  0x84   :  { %vm396_vm9 = vmor %vm394_vm5, %vm395_vm7  ;;  %v1738_v26 = vpop.eup %1737 }
  0x85   :  { %v378_v21 = vmul.f32 %v1734_v53, %v377_v59  ;;  %v391_v10 = vsub.f32 1.0, %v390_v61  ;;  %v404_v31 = vmul.f32 %v1738_v26, %v374_v56  ;;  %vm409_vm13 = vweird.f32 %v1738_v26 }
  0x86   :  { %vm410_vm15 = vmor %vm408_vm12, %vm409_vm13  ;;  %v2255_v59 = vand.u32 4294901760, %v673_v55  ;;  %v2264_v56 = vsub.f32 %v675_v29, %v2251_v57 }
  0x87   :  { %v379_v20 = vadd.f32 %v1734_v53, %v378_v21  ;;  %v392_v23 = vmul.f32 %v1736_v58, %v391_v10  ;;  %v405_v38 = vsub.f32 1.0, %v404_v31 }
  0x88   :  { %v434_v5 = vpop.permute.xlu0 %433  ;;  %v2270_v62 = vsub.f32 %v673_v55, %v2255_v59  ;;  %v727_v8 = vand.u32 4294901760, %v2264_v56  ;;  %832 = vmatpush.msrb.mxu0 %v2264_v56  ;;  %v664_v55 = vld [vmem:[#allocation7 + $0x20] sm:$0xff] }
  0x89   :  { %v383_v24 = vsel %vm2219_vm6, %v1734_v53, %v379_v20  ;;  %v393_v1 = vadd.f32 %v1736_v58, %v392_v23  ;;  %v406_v13 = vmul.f32 %v1738_v26, %v405_v38  ;;  %v669_v38 = vld [vmem:[#allocation7 + $0x48] sm:$0xff] }
  0x8a   :  { %v388_v27 = vsel %vm385_vm8, %v387_v11, %v383_v24  ;;  %v739_v3 = vand.u32 4294901760, %v2270_v62  ;;  %v728_v11 = vsub.f32 %v2264_v56, %v727_v8 }
  0x8b   :  { %v397_v28 = vsel %vm396_vm9, %v1736_v58, %v393_v1  ;;  %v417_v6 = vmul.f32 %v388_v27, %v2180_v63  ;;  %v418_v35 = vmul.f32 %v388_v27, %v2189_v2  ;;  %v407_v19 = vadd.f32 %v1738_v26, %v406_v13  ;;  %v442_v63 = vpop.permute.xlu1 %441 }
  0x8c   :  { %v402_v30 = vsel %vm399_vm10, %v401_v25, %v397_v28  ;;  %v2253_v58 = vand.u32 4294901760, %v674_v54  ;;  %v740_v24 = vsub.f32 %v2270_v62, %v739_v3  ;;  %v729_v25 = vand.u32 4294901760, %v728_v11 }
  0x8d   :  { %v419_v32 = vmul.f32 %v402_v30, %v2195_v9  ;;  %v420_v15 = vmul.f32 %v402_v30, %v2197_v22  ;;  %v444_v40 = vmul.f32 %v434_v5, %v417_v6  ;;  %v445_v18 = vmul.f32 %v434_v5, %v418_v35  ;;  %v672_v30 = vld [vmem:[#allocation7 + $0x60] sm:$0xff] }
  0x8e   :  { %v411_v41 = vsel %vm410_vm15, %v1738_v26, %v407_v19  ;;  %v2267_v21 = vsub.f32 %v674_v54, %v2253_v58  ;;  %892 = vmatpush.msrb.mxu1 %v2253_v58  ;;  %v741_v27 = vand.u32 4294901760, %v740_v24  ;;  %v2313_v31 = vand.u32 4294901760, %v672_v30 }
  0x8f   :  { %v416_v42 = vsel %vm413_vm0, %v415_v14, %v411_v41  ;;  %v450_v2 = vsel %vm344_vm11, %v444_v40, 0.0  ;;  %v455_v43 = vsel %vm344_vm11, %v445_v18, 0.0  ;;  %v2338_v14 = vand.u32 4294901760, %v669_v38  ;;  %v668_v40 = vld [vmem:[#allocation7 + $0x40] sm:$0xff] }
  0x90   :  { %v438_v4 = vpop.permute.xlu0 %437  ;;  %v421_v44 = vmul.f32 %v416_v42, %v2211_v16  ;;  %v422_v37 = vmul.f32 %v416_v42, %v2213_v34  ;;  %v733_v10 = vand.u32 4294901760, %v2267_v21  ;;  %835 = vmatpush.msrb.mxu0 %v2267_v21  ;;  %894 = vmatpush.msrb.mxu1 %v2255_v59  ;;  %v2352_v41 = vand.u32 4294901760, %v668_v40 }
  0x91   :  { %v446_v39 = vmul.f32 %v438_v4, %v419_v32  ;;  %v447_v17 = vmul.f32 %v438_v4, %v420_v15  ;;  %v671_v32 = vld [vmem:[#allocation7 + $0x58] sm:$0xff]  ;;  %v2316_v15 = vsub.f32 %v672_v30, %v2313_v31  ;;  %v2326_v4 = vand.u32 4294901760, %v670_v33 }
  0x92   :  { %v448_v47 = vmul.f32 %v442_v63, %v421_v44  ;;  %v449_v46 = vmul.f32 %v442_v63, %v422_v37  ;;  %v734_v23 = vsub.f32 %v2267_v21, %v733_v10  ;;  %838 = vmatpush.msrb.mxu0 %v2270_v62  ;;  %v2318_v12 = vand.u32 4294901760, %v671_v32  ;;  %896 = vmatpush.msrb.mxu1 %v2313_v31  ;;  %v667_v63 = vld [vmem:[#allocation7 + $0x38] sm:$0xff] }
  0x93   :  { %v451_v9 = vsel %vm344_vm11, %v446_v39, 0.0  ;;  %v456_v22 = vsel %vm344_vm11, %v447_v17, 0.0  ;;  %v745_v6 = vand.u32 4294901760, %v2316_v15  ;;  %v2336_v13 = vsub.f32 %v670_v33, %v2326_v4 }
  0x94   :  { %v452_v45 = vadd.f32 %v451_v9, %v450_v2  ;;  %v457_v36 = vadd.f32 %v456_v22, %v455_v43  ;;  %v453_v48 = vsel %vm344_vm11, %v448_v47, 0.0  ;;  %v458_v49 = vsel %vm344_vm11, %v449_v46, 0.0  ;;  %841 = vmatpush.msrb.mxu0 %v2316_v15  ;;  %898 = vmatpush.msrb.mxu1 %v2318_v12 }
  0x95   :  { %v735_v1 = vand.u32 4294901760, %v734_v23  ;;  %v2324_v35 = vsub.f32 %v671_v32, %v2318_v12  ;;  %v746_v39 = vsub.f32 %v2316_v15, %v745_v6  ;;  %v757_v9 = vand.u32 4294901760, %v2336_v13 }
  0x96   :  { %v454_v50 = vadd.f32 %v453_v48, %v452_v45  ;;  %v459_v51 = vadd.f32 %v458_v49, %v457_v36  ;;  %900 = vmatpush.msrb.mxu1 %v2326_v4  ;;  %v2348_v22 = vsub.f32 %v669_v38, %v2338_v14  ;;  %v2359_v44 = vand.u32 4294901760, %v667_v63  ;;  %v666_v45 = vld [vmem:[#allocation7 + $0x30] sm:$0xff] }
  0x97   :  { %v751_v17 = vand.u32 4294901760, %v2324_v35  ;;  %844 = vmatpush.msrb.mxu0 %v2324_v35  ;;  %v747_v18 = vand.u32 4294901760, %v746_v39  ;;  %v758_v2 = vsub.f32 %v2336_v13, %v757_v9  ;;  %v2363_v37 = vsub.f32 %v668_v40, %v2352_v41  ;;  %v662_v38 = vld [vmem:[#allocation7 + $0x10] sm:$0xff] }
  0x98   :  { %v465_v52 = vsel %vm344_vm11, %v454_v50, 0  ;;  %v468_v7 = vsel %vm344_vm11, %v459_v51, 0  ;;  %460 = vst.msk [vmem:[#allocation11] sm:$0xff] %vm344_vm11, %v454_v50  ;;  %902 = vmatpush.msrb.mxu1 %v2338_v14  ;;  %v763_v43 = vand.u32 4294901760, %v2348_v22  ;;  %v2371_v46 = vsub.f32 %v667_v63, %v2359_v44  ;;  %v665_v50 = vld [vmem:[#allocation7 + $0x28] sm:$0xff] }
  0x99   :  { %v2240_v53 = vand.u32 4294901760, %v465_v52  ;;  %v2242_v16 = vand.u32 4294901760, %v468_v7  ;;  %461 = vst.msk [vmem:[#allocation11 + $0x8] sm:$0xff] %vm344_vm11, %v459_v51  ;;  %v752_v19 = vsub.f32 %v2324_v35, %v751_v17  ;;  %847 = vmatpush.msrb.mxu0 %v2336_v13  ;;  %v759_v36 = vand.u32 4294901760, %v758_v2 }
  0x9a   :  { %904 = vmatpush.msrb.mxu1 %v2352_v41  ;;  %v764_v47 = vsub.f32 %v2348_v22, %v763_v43  ;;  %v2373_v48 = vand.u32 4294901760, %v666_v45  ;;  %v769_v49 = vand.u32 4294901760, %v2363_v37  ;;  %v2382_v29 = vand.u32 4294901760, %v665_v50  ;;  %1657 = dma.vmem_to_hbm [thread:$0]  %s1650_s2, 256, %s1652_s12, [#allocation12], %s1894_s9, %s1894_s9, %s1895_s10  }
  0x9b   :  { %v2246_v34 = vsub.f32 %v465_v52, %v2240_v53  ;;  %532 = vmatmul.f32.vlgmr.msra.gmra.mxu3 %v2240_v53  ;;  %625 = vmatmul.f32.vlgmr.msra.gmra.mxu0 %v2240_v53  ;;  %v2258_v60 = vsub.f32 %v468_v7, %v2242_v16  ;;  %v753_v42 = vand.u32 4294901760, %v752_v19  ;;  %v775_v52 = vand.u32 4294901760, %v2371_v46 }
  0x9c   :  { %652 = vmatmul.f32.vlgmr.msra.gmra.mxu1 %v2240_v53  ;;  %730 = vmatpush.msra.mxu3 %v729_v25  ;;  %v765_v51 = vand.u32 4294901760, %v764_v47  ;;  %v2380_v7 = vsub.f32 %v666_v45, %v2373_v48  ;;  %v770_v54 = vsub.f32 %v2363_v37, %v769_v49  ;;  %v2395_v23 = vsub.f32 %v665_v50, %v2382_v29 }
  0x9d   :  { %v2261_v61 = vand.u32 4294901760, %v2246_v34  ;;  %v2283_v20 = vand.u32 4294901760, %v2258_v60  ;;  %850 = vmatpush.msrb.mxu0 %v2348_v22  ;;  %906 = vmatpush.msrb.mxu1 %v2359_v44  ;;  %v2397_v24 = vand.u32 4294901760, %v664_v55  ;;  %v2417_v19 = vand.u32 4294901760, %v662_v38 }
  0x9e   :  { %736 = vmatpush.msra.mxu3 %v735_v1  ;;  %v781_v11 = vand.u32 4294901760, %v2380_v7  ;;  %v771_v25 = vand.u32 4294901760, %v770_v54  ;;  %v663_v1 = vld [vmem:[#allocation7 + $0x18] sm:$0xff]  ;;  %v787_v30 = vand.u32 4294901760, %v2395_v23 }
  0x9f   :  { %v491_v0 = vsub.f32 %v2246_v34, %v2261_v61  ;;  %v499_v26 = vsub.f32 %v2258_v60, %v2283_v20  ;;  %853 = vmatpush.msrb.mxu0 %v2363_v37  ;;  %908 = vmatpush.msrb.mxu1 %v2373_v48  ;;  %v2407_v32 = vsub.f32 %v664_v55, %v2397_v24  ;;  %v2410_v33 = vand.u32 4294901760, %v663_v1 }
  0xa0   :  { %742 = vmatpush.msra.mxu3 %v741_v27  ;;  %v782_v27 = vsub.f32 %v2380_v7, %v781_v11  ;;  %v788_v40 = vsub.f32 %v2395_v23, %v787_v30 }
  0xa1   :  { %v2280_v5 = vand.u32 4294901760, %v491_v0  ;;  %v2305_v28 = vand.u32 4294901760, %v499_v26  ;;  %856 = vmatpush.msrb.mxu0 %v2371_v46  ;;  %v776_v0 = vsub.f32 %v2371_v46, %v775_v52  ;;  %910 = vmatpush.msrb.mxu1 %v2382_v29  ;;  %v2422_v63 = vsub.f32 %v663_v1, %v2410_v33 }
  0xa2   :  { %748 = vmatpush.msra.mxu3 %v747_v18  ;;  %v783_v39 = vand.u32 4294901760, %v782_v27  ;;  %v793_v18 = vand.u32 4294901760, %v2407_v32  ;;  %v789_v2 = vand.u32 4294901760, %v788_v40 }
  0xa3   :  { %493 = vmatmul.f32.vlgmr.msra.gmra.mxu2 %v2280_v5  ;;  %536 = vmatmul.f32.gmra.mxu3 %v2242_v16  ;;  %v777_v26 = vand.u32 4294901760, %v776_v0  ;;  %v799_v50 = vand.u32 4294901760, %v2422_v63 }
  0xa4   :  { %629 = vmatmul.f32.gmra.mxu0 %v2242_v16  ;;  %656 = vmatmul.f32.gmra.mxu1 %v2242_v16  ;;  %v794_v45 = vsub.f32 %v2407_v32, %v793_v18 }
  0xa5   :  { %677 = vmatpush.msra.mxu2 %v2251_v57  ;;  %754 = vmatpush.msra.mxu3 %v753_v42  ;;  %v661_v42 = vld [vmem:[#allocation7 + $0x8] sm:$0xff]  ;;  %v800_v1 = vsub.f32 %v2422_v63, %v799_v50 }
  0xa6   :  { %859 = vmatpush.msrb.mxu0 %v2380_v7  ;;  %912 = vmatpush.msrb.mxu1 %v2397_v24  ;;  %v2431_v47 = vand.u32 4294901760, %v661_v42  ;;  %v795_v54 = vand.u32 4294901760, %v794_v45 }
  0xa7   :  { %679 = vmatpush.msra.mxu2 %v2253_v58  ;;  %760 = vmatpush.msra.mxu3 %v759_v36  ;;  %v2429_v36 = vsub.f32 %v662_v38, %v2417_v19 }
  0xa8   :  { %862 = vmatpush.msrb.mxu0 %v2395_v23  ;;  %914 = vmatpush.msrb.mxu1 %v2410_v33  ;;  %v810_v0 = vsub.f32 %v661_v42, %v2431_v47 }
  0xa9   :  { %681 = vmatpush.msra.mxu2 %v2255_v59  ;;  %766 = vmatpush.msra.mxu3 %v765_v51  ;;  %v660_v51 = vld [vmem:[#allocation7] sm:$0xff]  ;;  %v805_v55 = vand.u32 4294901760, %v2429_v36 }
  0xaa   :  { %865 = vmatpush.msrb.mxu0 %v2407_v32  ;;  %916 = vmatpush.msrb.mxu1 %v2417_v19  ;;  %v811_v27 = vand.u32 4294901760, %v810_v0 }
  0xab   :  { %501 = vmatmul.f32.gmra.mxu2 %v2305_v28  ;;  %592 = vmatmul.f32.vlgmr.msrb.gmra.mxu3 %v2261_v61 }
  0xac   :  { %683 = vmatpush.msra.mxu2 %v2313_v31  ;;  %772 = vmatpush.msra.mxu3 %v771_v25  ;;  %v706_v25 = vand.u32 4294901760, %v660_v51  ;;  %v812_v42 = vsub.f32 %v810_v0, %v811_v27 }
  0xad   :  { %868 = vmatpush.msrb.mxu0 %v2422_v63  ;;  %918 = vmatpush.msrb.mxu1 %v2431_v47 }
  0xae   :  { %685 = vmatpush.msra.mxu2 %v2318_v12  ;;  %778 = vmatpush.msra.mxu3 %v777_v26  ;;  %v806_v26 = vsub.f32 %v2429_v36, %v805_v55  ;;  %v816_v38 = vsub.f32 %v660_v51, %v706_v25  ;;  %v813_v63 = vand.u32 4294901760, %v812_v42 }
  0xaf   :  { %871 = vmatpush.msrb.mxu0 %v2429_v36  ;;  %920 = vmatpush.msrb.mxu1 %v706_v25 }
  0xb0   :  { %687 = vmatpush.msra.mxu2 %v2326_v4  ;;  %784 = vmatpush.msra.mxu3 %v783_v39  ;;  %v801_v39 = vand.u32 4294901760, %v800_v1  ;;  %v807_v40 = vand.u32 4294901760, %v806_v26  ;;  %v817_v45 = vand.u32 4294901760, %v816_v38 }
  0xb1   :  { %874 = vmatpush.msrb.mxu0 %v810_v0 }
  0xb2   :  { %689 = vmatpush.msra.mxu2 %v2338_v14  ;;  %790 = vmatpush.msra.mxu3 %v789_v2  ;;  %v818_v2 = vsub.f32 %v816_v38, %v817_v45 }
  0xb3   :  { %562 = vmatmul.f32.vlgmr.msrb.gmra.mxu2 %v2246_v34  ;;  %598 = vmatmul.f32.gmra.mxu3 %v2283_v20 }
  0xb4   :  { %691 = vmatpush.msra.mxu2 %v2352_v41  ;;  %796 = vmatpush.msra.mxu3 %v795_v54  ;;  %v819_v36 = vand.u32 4294901760, %v818_v2 }
  0xb5   :  { %877 = vmatpush.msrb.mxu0 %v816_v38 }
  0xb6   :  { %693 = vmatpush.msra.mxu2 %v2359_v44  ;;  %802 = vmatpush.msra.mxu3 %v801_v39 }
  0xb8   :  { %695 = vmatpush.msra.mxu2 %v2373_v48  ;;  %808 = vmatpush.msra.mxu3 %v807_v40 }
  0xba   :  { %697 = vmatpush.msra.mxu2 %v2382_v29  ;;  %814 = vmatpush.msra.mxu3 %v813_v63 }
  0xbb   :  { %567 = vmatmul.f32.gmra.mxu2 %v2258_v60 }
  0xbc   :  { %699 = vmatpush.msra.mxu2 %v2397_v24  ;;  %820 = vmatpush.msra.mxu3 %v819_v36 }
  0xbe   :  { %701 = vmatpush.msra.mxu2 %v2410_v33  ;;  %1008 = vmatpush.msrb.mxu3 %v2251_v57 }
  0xc0   :  { %703 = vmatpush.msra.mxu2 %v2417_v19  ;;  %1010 = vmatpush.msrb.mxu3 %v2253_v58 }
  0xc2   :  { %705 = vmatpush.msra.mxu2 %v2431_v47  ;;  %1012 = vmatpush.msrb.mxu3 %v2255_v59 }
  0xc4   :  { %707 = vmatpush.msra.mxu2 %v706_v25  ;;  %1014 = vmatpush.msrb.mxu3 %v2313_v31 }
  0xc6   :  { %937 = vmatpush.msrb.mxu2 %v727_v8  ;;  %1016 = vmatpush.msrb.mxu3 %v2318_v12 }
  0xc8   :  { %941 = vmatpush.msrb.mxu2 %v733_v10  ;;  %1018 = vmatpush.msrb.mxu3 %v2326_v4 }
  0xca   :  { %945 = vmatpush.msrb.mxu2 %v739_v3  ;;  %1020 = vmatpush.msrb.mxu3 %v2338_v14 }
  0xcc   :  { %949 = vmatpush.msrb.mxu2 %v745_v6  ;;  %1022 = vmatpush.msrb.mxu3 %v2352_v41 }
  0xce   :  { %953 = vmatpush.msrb.mxu2 %v751_v17  ;;  %1024 = vmatpush.msrb.mxu3 %v2359_v44 }
  0xd0   :  { %957 = vmatpush.msrb.mxu2 %v757_v9  ;;  %1026 = vmatpush.msrb.mxu3 %v2373_v48 }
  0xd2   :  { %961 = vmatpush.msrb.mxu2 %v763_v43  ;;  %1028 = vmatpush.msrb.mxu3 %v2382_v29 }
  0xd4   :  { %965 = vmatpush.msrb.mxu2 %v769_v49  ;;  %1030 = vmatpush.msrb.mxu3 %v2397_v24 }
  0xd6   :  { %969 = vmatpush.msrb.mxu2 %v775_v52  ;;  %1032 = vmatpush.msrb.mxu3 %v2410_v33 }
  0xd8   :  { %973 = vmatpush.msrb.mxu2 %v781_v11  ;;  %1034 = vmatpush.msrb.mxu3 %v2417_v19 }
  0xda   :  { %977 = vmatpush.msrb.mxu2 %v787_v30  ;;  %1036 = vmatpush.msrb.mxu3 %v2431_v47 }
  0xdc   :  { %981 = vmatpush.msrb.mxu2 %v793_v18  ;;  %1038 = vmatpush.msrb.mxu3 %v706_v25 }
  0xde   :  { %985 = vmatpush.msrb.mxu2 %v799_v50 }
  0xe0   :  { %989 = vmatpush.msrb.mxu2 %v805_v55 }
  0xe2   :  { %993 = vmatpush.msrb.mxu2 %v811_v27 }
  0xe4   :  { %997 = vmatpush.msrb.mxu2 %v817_v45 }
 0x118   :  { %v626_v3 = vpop.f32.mrf.mxu0 }
 0x119   :  { %v653_v15 = vpop.f32.mrf.mxu1 }
 0x11e   :  { %v533_v57 = vpop.f32.mrf.mxu3 }
 0x121   :  { %v630_v41 = vpop.f32.mrf.mxu0  ;;  %v657_v37 = vpop.f32.mrf.mxu1 }
 0x126   :  { %v494_v58 = vpop.f32.mrf.mxu2  ;;  %v537_v59 = vpop.f32.mrf.mxu3 }
 0x127   :  { %v534_v21 = vadd.f32 %v533_v57, %v494_v58 }
 0x12e   :  { %v502_v56 = vpop.f32.mrf.mxu2  ;;  %v593_v62 = vpop.f32.mrf.mxu3 }
 0x12f   :  { %v538_v6 = vadd.f32 %v537_v59, %v502_v56 }
 0x136   :  { %v563_v8 = vpop.f32.mrf.mxu2  ;;  %v599_v14 = vpop.f32.mrf.mxu3 }
 0x137   :  { %v564_v10 = vadd.f32 %v563_v8, %v534_v21 }
 0x139   :  { %v594_v31 = vadd.f32 %v593_v62, %v564_v10  ;;  %v1255_v10 = vld [vmem:[#allocation8 + $0x78] sm:$0xff] }
 0x13b   :  { %v627_v12 = vadd.f32 %v626_v3, %v594_v31  ;;  %v1254_v3 = vld [vmem:[#allocation8 + $0x70] sm:$0xff]  ;;  %v1253_v31 = vld [vmem:[#allocation8 + $0x68] sm:$0xff] }
 0x13d   :  { %v654_v35 = vadd.f32 %v653_v15, %v627_v12  ;;  %v2492_v12 = vand.u32 4294901760, %v1255_v10 }
 0x13e   :  { %v568_v4 = vpop.f32.mrf.mxu2 }
 0x13f   :  { %v569_v17 = vadd.f32 %v568_v4, %v538_v6  ;;  %v708_v13 = vand.u32 4294901760, %v654_v35  ;;  %v2494_v6 = vand.u32 4294901760, %v1254_v3  ;;  %v1252_v4 = vld [vmem:[#allocation8 + $0x60] sm:$0xff] }
 0x141   :  { %v600_v9 = vadd.f32 %v599_v14, %v569_v17  ;;  %822 = vmatmul.f32.vlgmr.msra.gmra.mxu3 %v708_v13  ;;  %v709_v22 = vsub.f32 %v654_v35, %v708_v13  ;;  %v2496_v35 = vand.u32 4294901760, %v1253_v31  ;;  %v1251_v17 = vld [vmem:[#allocation8 + $0x58] sm:$0xff]  ;;  %v2498_v14 = vand.u32 4294901760, %v1252_v4 }
 0x143   :  { %v631_v43 = vadd.f32 %v630_v41, %v600_v9  ;;  %880 = vmatmul.f32.vlgmr.msrb.gmra.mxu0 %v709_v22  ;;  %v710_v44 = vand.u32 4294901760, %v709_v22 }
 0x145   :  { %v658_v46 = vadd.f32 %v657_v37, %v631_v43  ;;  %v711_v48 = vsub.f32 %v709_v22, %v710_v44  ;;  %924 = vmatmul.f32.vlgmr.msrb.gmra.mxu1 %v710_v44  ;;  %v1249_v22 = vld [vmem:[#allocation8 + $0x48] sm:$0xff]  ;;  %v2505_v43 = vsub.f32 %v1255_v10, %v2492_v12  ;;  %v2508_v44 = vsub.f32 %v1254_v3, %v2494_v6  ;;  %v1243_v3 = vld [vmem:[#allocation8 + $0x18] sm:$0xff] }
 0x146   :  { %v2511_v37 = vsub.f32 %v1253_v31, %v2496_v35 }
 0x147   :  { %v712_v49 = vand.u32 4294901760, %v711_v48  ;;  %v716_v52 = vand.u32 4294901760, %v658_v46  ;;  %v2515_v48 = vsub.f32 %v1252_v4, %v2498_v14 }
 0x149   :  { %713 = vmatmul.f32.vlgmr.msra.gmra.mxu2 %v712_v49  ;;  %826 = vmatmul.f32.gmra.mxu3 %v716_v52  ;;  %v717_v7 = vsub.f32 %v658_v46, %v716_v52 }
 0x14b   :  { %885 = vmatmul.f32.gmra.mxu0 %v717_v7  ;;  %v718_v29 = vand.u32 4294901760, %v717_v7 }
 0x14d   :  { %930 = vmatmul.f32.gmra.mxu1 %v718_v29  ;;  %v719_v11 = vsub.f32 %v717_v7, %v718_v29  ;;  %v1313_v7 = vand.u32 4294901760, %v2508_v44  ;;  %v1319_v29 = vand.u32 4294901760, %v2511_v37 }
 0x14f   :  { %v720_v23 = vand.u32 4294901760, %v719_v11  ;;  %v2524_v11 = vand.u32 4294901760, %v1249_v22 }
 0x151   :  { %721 = vmatmul.f32.gmra.mxu2 %v720_v23  ;;  %1040 = vmatmul.f32.vlgmr.msrb.gmra.mxu3 %v708_v13 }
 0x159   :  { %999 = vmatmul.f32.vlgmr.msrb.gmra.mxu2 %v708_v13  ;;  %1044 = vmatmul.f32.gmra.mxu3 %v716_v52  ;;  %v1250_v13 = vld [vmem:[#allocation8 + $0x50] sm:$0xff] }
 0x15a   :  { %v2502_v9 = vand.u32 4294901760, %v1250_v13 }
 0x161   :  { %1003 = vmatmul.f32.gmra.mxu2 %v716_v52  ;;  %v1307_v52 = vand.u32 4294901760, %v2505_v43 }
 0x163   :  { %v1308_v23 = vsub.f32 %v2505_v43, %v1307_v52 }
 0x1c0   :  { %v881_v18 = vpop.f32.mrf.mxu0 }
 0x1c2   :  { %v925_v50 = vpop.f32.mrf.mxu1 }
 0x1c4   :  { %v823_v24 = vpop.f32.mrf.mxu3 }
 0x1c8   :  { %v886_v1 = vpop.f32.mrf.mxu0 }
 0x1ca   :  { %v931_v39 = vpop.f32.mrf.mxu1 }
 0x1cc   :  { %v714_v30 = vpop.f32.mrf.mxu2  ;;  %v827_v32 = vpop.f32.mrf.mxu3 }
 0x1cd   :  { %v824_v33 = vadd.f32 %v823_v24, %v714_v30  ;;  %v1314_v24 = vsub.f32 %v2508_v44, %v1313_v7  ;;  %v1325_v30 = vand.u32 4294901760, %v2515_v48 }
 0x1cf   :  { %v882_v47 = vadd.f32 %v881_v18, %v824_v33  ;;  %v1309_v33 = vand.u32 4294901760, %v1308_v23  ;;  %v1320_v18 = vsub.f32 %v2511_v37, %v1319_v29 }
 0x1d1   :  { %v926_v54 = vadd.f32 %v925_v50, %v882_v47  ;;  %v2548_v47 = vsub.f32 %v1249_v22, %v2524_v11  ;;  %v1315_v50 = vand.u32 4294901760, %v1314_v24  ;;  %v1242_v22 = vld [vmem:[#allocation8 + $0x10] sm:$0xff] }
 0x1d2   :  { %v2647_v24 = vand.u32 4294901760, %v1242_v22 }
 0x1d4   :  { %v722_v19 = vpop.f32.mrf.mxu2  ;;  %v1041_v55 = vpop.f32.mrf.mxu3 }
 0x1d5   :  { %v828_v51 = vadd.f32 %v827_v32, %v722_v19  ;;  %v2537_v32 = vsub.f32 %v1250_v13, %v2502_v9 }
 0x1d7   :  { %v887_v26 = vadd.f32 %v886_v1, %v828_v51  ;;  %v1321_v51 = vand.u32 4294901760, %v1320_v18  ;;  %v1241_v18 = vld [vmem:[#allocation8 + $0x8] sm:$0xff] }
 0x1d9   :  { %v932_v40 = vadd.f32 %v931_v39, %v887_v26  ;;  %v1247_v39 = vld [vmem:[#allocation8 + $0x38] sm:$0xff] }
 0x1dc   :  { %v1000_v0 = vpop.f32.mrf.mxu2  ;;  %v1045_v2 = vpop.f32.mrf.mxu3 }
 0x1dd   :  { %v1001_v25 = vadd.f32 %v1000_v0, %v926_v54 }
 0x1df   :  { %v1042_v27 = vadd.f32 %v1041_v55, %v1001_v25  ;;  %v1343_v55 = vand.u32 4294901760, %v2548_v47 }
 0x1e1   :  { %v1048_v38 = vmax.f32 %v1042_v27, 0.0  ;;  %v1344_v26 = vsub.f32 %v2548_v47, %v1343_v55 }
 0x1e3   :  { %v2485_v42 = vand.u32 4294901760, %v1048_v38 }
 0x1e4   :  { %v1004_v45 = vpop.f32.mrf.mxu2 }
 0x1e5   :  { %v1005_v63 = vadd.f32 %v1004_v45, %v932_v40  ;;  %v1106_v57 = vsub.f32 %v1048_v38, %v2485_v42 }
 0x1e7   :  { %v1046_v36 = vadd.f32 %v1045_v2, %v1005_v63  ;;  %v1107_v56 = vand.u32 4294901760, %v1106_v57  ;;  %v1245_v63 = vld [vmem:[#allocation8 + $0x28] sm:$0xff] }
 0x1e9   :  { %v1049_v58 = vmax.f32 %v1046_v36, 0.0  ;;  %v1108_v8 = vsub.f32 %v1106_v57, %v1107_v56 }
 0x1eb   :  { %v1064_v59 = vand.u32 4294901760, %v1049_v58  ;;  %v1109_v46 = vand.u32 4294901760, %v1108_v8 }
 0x1ed   :  { %v1100_v21 = vsub.f32 %v1049_v58, %v1064_v59  ;;  %1065 = vmatpush.msra.mxu0 %v1064_v59  ;;  %1228 = vmatpush.msra.mxu3 %v1064_v59  ;;  %v2612_v58 = vand.u32 4294901760, %v1245_v63 }
 0x1ef   :  { %1067 = vmatpush.msra.mxu0 %v2485_v42  ;;  %1230 = vmatpush.msra.mxu3 %v2485_v42  ;;  %v1101_v62 = vand.u32 4294901760, %v1100_v21  ;;  %v2622_v8 = vsub.f32 %v1245_v63, %v2612_v58 }
 0x1f0   :  { %1073 = vmatmul.f32.vlgmr.msra.gmra.mxu0 %v2280_v5  ;;  %1232 = vmatmul.f32.vlgmr.msra.gmra.mxu3 %v2240_v53  ;;  %v2500_v5 = vand.u32 4294901760, %v1251_v17 }
 0x1f1   :  { %1136 = vmatpush.msrb.mxu0 %v1100_v21  ;;  %1199 = vmatpush.msra.mxu2 %v1101_v62  ;;  %v1102_v15 = vsub.f32 %v1100_v21, %v1101_v62  ;;  %v1367_v4 = vand.u32 4294901760, %v2622_v8 }
 0x1f2   :  { %v2519_v49 = vsub.f32 %v1251_v17, %v2500_v5  ;;  %1470 = vmatpush.msrb.mxu3 %v2492_v12  ;;  %v2633_v17 = vand.u32 4294901760, %v1243_v3 }
 0x1f3   :  { %1139 = vmatpush.msrb.mxu0 %v1106_v57  ;;  %1203 = vmatpush.msra.mxu2 %v1107_v56  ;;  %v1103_v41 = vand.u32 4294901760, %v1102_v15 }
 0x1f4   :  { %1205 = vmatmul.f32.vlgmr.msra.gmra.mxu2 %v2240_v53  ;;  %v1331_v19 = vand.u32 4294901760, %v2519_v49  ;;  %1472 = vmatpush.msrb.mxu3 %v2494_v6  ;;  %v2645_v23 = vsub.f32 %v1243_v3, %v2633_v17 }
 0x1f5   :  { %1257 = vmatpush.msra.mxu0 %v2492_v12  ;;  %1104 = vmatpush.msra.mxu1 %v1103_v41 }
 0x1f6   :  { %1412 = vmatpush.msrb.mxu2 %v2505_v43  ;;  %v1332_v54 = vsub.f32 %v2519_v49, %v1331_v19  ;;  %1474 = vmatpush.msrb.mxu3 %v2496_v35 }
 0x1f7   :  { %1259 = vmatpush.msra.mxu0 %v2494_v6  ;;  %1110 = vmatpush.msra.mxu1 %v1109_v46  ;;  %v1368_v46 = vsub.f32 %v2622_v8, %v1367_v4 }
 0x1f8   :  { %1415 = vmatpush.msrb.mxu2 %v2508_v44  ;;  %1081 = vmatmul.f32.gmra.mxu0 %v2305_v28  ;;  %v1337_v28 = vand.u32 4294901760, %v2537_v32  ;;  %v1333_v1 = vand.u32 4294901760, %v1332_v54  ;;  %v2654_v54 = vand.u32 4294901760, %v1241_v18 }
 0x1f9   :  { %1112 = vmatmul.f32.vlgmr.msra.gmra.mxu1 %v2240_v53  ;;  %1236 = vmatmul.f32.gmra.mxu3 %v2242_v16  ;;  %v1326_v53 = vsub.f32 %v2515_v48, %v1325_v30 }
 0x1fa   :  { %1166 = vmatpush.msrb.mxu1 %v1064_v59  ;;  %1261 = vmatpush.msra.mxu0 %v2496_v35  ;;  %v1338_v25 = vsub.f32 %v2537_v32, %v1337_v28  ;;  %v1244_v59 = vld [vmem:[#allocation8 + $0x20] sm:$0xff] }
 0x1fb   :  { %1418 = vmatpush.msrb.mxu2 %v2511_v37  ;;  %v1327_v0 = vand.u32 4294901760, %v1326_v53  ;;  %1476 = vmatpush.msrb.mxu3 %v2498_v14  ;;  %v2626_v10 = vand.u32 4294901760, %v1244_v59  ;;  %v1379_v53 = vand.u32 4294901760, %v2645_v23 }
 0x1fc   :  { %1168 = vmatpush.msrb.mxu1 %v2485_v42  ;;  %1209 = vmatmul.f32.gmra.mxu2 %v2242_v16  ;;  %v1339_v27 = vand.u32 4294901760, %v1338_v25  ;;  %v2592_v42 = vand.u32 4294901760, %v1247_v39  ;;  %v1240_v25 = vld [vmem:[#allocation8] sm:$0xff] }
 0x1fd   :  { %1263 = vmatpush.msra.mxu0 %v2498_v14  ;;  %1421 = vmatpush.msrb.mxu2 %v2515_v48  ;;  %v2637_v13 = vsub.f32 %v1244_v59, %v2626_v10 }
 0x1fe   :  { %1310 = vmatpush.msra.mxu1 %v1309_v33  ;;  %1478 = vmatpush.msrb.mxu3 %v2500_v5  ;;  %v2598_v45 = vsub.f32 %v1247_v39, %v2592_v42 }
 0x1ff   :  { %1265 = vmatpush.msra.mxu0 %v2500_v5  ;;  %1424 = vmatpush.msrb.mxu2 %v2519_v49  ;;  %v1373_v33 = vand.u32 4294901760, %v2637_v13 }
 0x200   :  { %1316 = vmatpush.msra.mxu1 %v1315_v50  ;;  %1142 = vmatmul.f32.vlgmr.msrb.gmra.mxu0 %v2246_v34  ;;  %v1248_v34 = vld [vmem:[#allocation8 + $0x40] sm:$0xff]  ;;  %v1355_v36 = vand.u32 4294901760, %v2598_v45  ;;  %v1369_v50 = vand.u32 4294901760, %v1368_v46 }
 0x201   :  { %1116 = vmatmul.f32.gmra.mxu1 %v2242_v16  ;;  %1267 = vmatpush.msra.mxu0 %v2502_v9  ;;  %v1345_v16 = vand.u32 4294901760, %v1344_v26  ;;  %v2587_v38 = vand.u32 4294901760, %v1248_v34 }
 0x202   :  { %1322 = vmatpush.msra.mxu1 %v1321_v51  ;;  %1427 = vmatpush.msrb.mxu2 %v2537_v32  ;;  %v1356_v21 = vsub.f32 %v2598_v45, %v1355_v36  ;;  %v1384_v51 = vsub.f32 %v1242_v22, %v2647_v24 }
 0x203   :  { %1269 = vmatpush.msra.mxu0 %v2524_v11  ;;  %1480 = vmatpush.msrb.mxu3 %v2502_v9  ;;  %v2590_v40 = vsub.f32 %v1248_v34, %v2587_v38 }
 0x204   :  { %1328 = vmatpush.msra.mxu1 %v1327_v0  ;;  %1430 = vmatpush.msrb.mxu2 %v2548_v47  ;;  %v1357_v31 = vand.u32 4294901760, %v1356_v21  ;;  %v1374_v0 = vsub.f32 %v2637_v13, %v1373_v33  ;;  %v1385_v26 = vand.u32 4294901760, %v1384_v51 }
 0x205   :  { %1482 = vmatpush.msrb.mxu3 %v2524_v11  ;;  %1271 = vmatpush.msra.mxu0 %v2587_v38 }
 0x206   :  { %1334 = vmatpush.msra.mxu1 %v1333_v1  ;;  %1433 = vmatpush.msrb.mxu2 %v2590_v40  ;;  %v1380_v1 = vsub.f32 %v2645_v23, %v1379_v53  ;;  %v1375_v34 = vand.u32 4294901760, %v1374_v0 }
 0x207   :  { %1484 = vmatpush.msrb.mxu3 %v2587_v38  ;;  %1273 = vmatpush.msra.mxu0 %v2592_v42 }
 0x208   :  { %1340 = vmatpush.msra.mxu1 %v1339_v27  ;;  %1147 = vmatmul.f32.gmra.mxu0 %v2258_v60  ;;  %v1246_v60 = vld [vmem:[#allocation8 + $0x30] sm:$0xff]  ;;  %v1390_v27 = vsub.f32 %v1241_v18, %v2654_v54  ;;  %v1381_v39 = vand.u32 4294901760, %v1380_v1 }
 0x209   :  { %1172 = vmatmul.f32.vlgmr.msrb.gmra.mxu1 %v2261_v61  ;;  %v1349_v61 = vand.u32 4294901760, %v2590_v40  ;;  %1486 = vmatpush.msrb.mxu3 %v2592_v42 }
 0x20a   :  { %1346 = vmatpush.msra.mxu1 %v1345_v16  ;;  %1436 = vmatpush.msrb.mxu2 %v2598_v45  ;;  %v1286_v16 = vand.u32 4294901760, %v1240_v25  ;;  %v1391_v63 = vand.u32 4294901760, %v1390_v27 }
 0x20b   :  { %v1350_v2 = vsub.f32 %v2590_v40, %v1349_v61 }
 0x20d   :  { %v1351_v56 = vand.u32 4294901760, %v1350_v2  ;;  %v1396_v2 = vsub.f32 %v1240_v25, %v1286_v16 }
 0x20f   :  { %1352 = vmatpush.msra.mxu1 %v1351_v56  ;;  %v1392_v56 = vsub.f32 %v1390_v27, %v1391_v63  ;;  %v1397_v21 = vand.u32 4294901760, %v1396_v2 }
 0x211   :  { %1178 = vmatmul.f32.gmra.mxu1 %v2283_v20  ;;  %v2600_v20 = vand.u32 4294901760, %v1246_v60  ;;  %v1393_v3 = vand.u32 4294901760, %v1392_v56 }
 0x212   :  { %1358 = vmatpush.msra.mxu1 %v1357_v31  ;;  %v1398_v31 = vsub.f32 %v1396_v2, %v1397_v21 }
 0x213   :  { %v2610_v57 = vsub.f32 %v1246_v60, %v2600_v20  ;;  %1275 = vmatpush.msra.mxu0 %v2600_v20  ;;  %1488 = vmatpush.msrb.mxu3 %v2600_v20  ;;  %v1386_v60 = vsub.f32 %v1384_v51, %v1385_v26 }
 0x215   :  { %v1361_v62 = vand.u32 4294901760, %v2610_v57  ;;  %1277 = vmatpush.msra.mxu0 %v2612_v58  ;;  %1439 = vmatpush.msrb.mxu2 %v2610_v57  ;;  %v1387_v59 = vand.u32 4294901760, %v1386_v60 }
 0x216   :  { %1490 = vmatpush.msrb.mxu3 %v2612_v58 }
 0x217   :  { %v1362_v15 = vsub.f32 %v2610_v57, %v1361_v62  ;;  %1442 = vmatpush.msrb.mxu2 %v2622_v8  ;;  %1279 = vmatpush.msra.mxu0 %v2626_v10 }
 0x218   :  { %1492 = vmatpush.msrb.mxu3 %v2626_v10 }
 0x219   :  { %v1363_v41 = vand.u32 4294901760, %v1362_v15  ;;  %1281 = vmatpush.msra.mxu0 %v2633_v17  ;;  %1445 = vmatpush.msrb.mxu2 %v2637_v13  ;;  %v1399_v15 = vand.u32 4294901760, %v1398_v31 }
 0x21a   :  { %1494 = vmatpush.msrb.mxu3 %v2633_v17 }
 0x21b   :  { %1364 = vmatpush.msra.mxu1 %v1363_v41  ;;  %1283 = vmatpush.msra.mxu0 %v2647_v24 }
 0x21c   :  { %1448 = vmatpush.msrb.mxu2 %v2645_v23  ;;  %1496 = vmatpush.msrb.mxu3 %v2647_v24 }
 0x21d   :  { %1370 = vmatpush.msra.mxu1 %v1369_v50  ;;  %1285 = vmatpush.msra.mxu0 %v2654_v54 }
 0x21e   :  { %1451 = vmatpush.msrb.mxu2 %v1384_v51  ;;  %1498 = vmatpush.msrb.mxu3 %v2654_v54 }
 0x21f   :  { %1376 = vmatpush.msra.mxu1 %v1375_v34  ;;  %1287 = vmatpush.msra.mxu0 %v1286_v16 }
 0x220   :  { %1454 = vmatpush.msrb.mxu2 %v1390_v27  ;;  %1500 = vmatpush.msrb.mxu3 %v1286_v16 }
 0x221   :  { %1517 = vmatpush.msrb.mxu0 %v1307_v52  ;;  %1382 = vmatpush.msra.mxu1 %v1381_v39 }
 0x222   :  { %1457 = vmatpush.msrb.mxu2 %v1396_v2 }
 0x223   :  { %1521 = vmatpush.msrb.mxu0 %v1313_v7  ;;  %1388 = vmatpush.msra.mxu1 %v1387_v59 }
 0x225   :  { %1525 = vmatpush.msrb.mxu0 %v1319_v29  ;;  %1394 = vmatpush.msra.mxu1 %v1393_v3 }
 0x227   :  { %1529 = vmatpush.msrb.mxu0 %v1325_v30  ;;  %1400 = vmatpush.msra.mxu1 %v1399_v15 }
 0x229   :  { %1588 = vmatpush.msrb.mxu1 %v2492_v12  ;;  %1533 = vmatpush.msrb.mxu0 %v1331_v19 }
 0x22b   :  { %1590 = vmatpush.msrb.mxu1 %v2494_v6  ;;  %1537 = vmatpush.msrb.mxu0 %v1337_v28 }
 0x22d   :  { %1592 = vmatpush.msrb.mxu1 %v2496_v35  ;;  %1541 = vmatpush.msrb.mxu0 %v1343_v55 }
 0x22f   :  { %1594 = vmatpush.msrb.mxu1 %v2498_v14  ;;  %1545 = vmatpush.msrb.mxu0 %v1349_v61 }
 0x231   :  { %1596 = vmatpush.msrb.mxu1 %v2500_v5  ;;  %1549 = vmatpush.msrb.mxu0 %v1355_v36 }
 0x233   :  { %1598 = vmatpush.msrb.mxu1 %v2502_v9  ;;  %1553 = vmatpush.msrb.mxu0 %v1361_v62 }
 0x235   :  { %1600 = vmatpush.msrb.mxu1 %v2524_v11  ;;  %1557 = vmatpush.msrb.mxu0 %v1367_v4 }
 0x237   :  { %1602 = vmatpush.msrb.mxu1 %v2587_v38  ;;  %1561 = vmatpush.msrb.mxu0 %v1373_v33 }
 0x239   :  { %1604 = vmatpush.msrb.mxu1 %v2592_v42  ;;  %1565 = vmatpush.msrb.mxu0 %v1379_v53 }
 0x23b   :  { %1606 = vmatpush.msrb.mxu1 %v2600_v20  ;;  %1569 = vmatpush.msrb.mxu0 %v1385_v26 }
 0x23d   :  { %1608 = vmatpush.msrb.mxu1 %v2612_v58  ;;  %1573 = vmatpush.msrb.mxu0 %v1391_v63 }
 0x23f   :  { %1610 = vmatpush.msrb.mxu1 %v2626_v10  ;;  %1577 = vmatpush.msrb.mxu0 %v1397_v21 }
 0x241   :  { %1612 = vmatpush.msrb.mxu1 %v2633_v17 }
 0x243   :  { %1614 = vmatpush.msrb.mxu1 %v2647_v24 }
 0x245   :  { %1616 = vmatpush.msrb.mxu1 %v2654_v54 }
 0x247   :  { %1618 = vmatpush.msrb.mxu1 %v1286_v16 }
 0x26d   :  { %v1074_v12 = vpop.f32.mrf.mxu0 }
 0x273   :  { %v1233_v49 = vpop.f32.mrf.mxu3 }
 0x275   :  { %v1082_v6 = vpop.f32.mrf.mxu0 }
 0x276   :  { %v1113_v35 = vpop.f32.mrf.mxu1 }
 0x277   :  { %v1114_v9 = vadd.f32 %v1113_v35, %v1074_v12  ;;  %v1206_v44 = vpop.f32.mrf.mxu2 }
 0x27c   :  { %v1237_v42 = vpop.f32.mrf.mxu3 }
 0x27d   :  { %v1143_v5 = vpop.f32.mrf.mxu0 }
 0x27e   :  { %v1117_v14 = vpop.f32.mrf.mxu1  ;;  %v1144_v43 = vadd.f32 %v1143_v5, %v1114_v9 }
 0x27f   :  { %v1118_v29 = vadd.f32 %v1117_v14, %v1082_v6  ;;  %v1210_v55 = vpop.f32.mrf.mxu2 }
 0x285   :  { %v1148_v7 = vpop.f32.mrf.mxu0 }
 0x286   :  { %v1173_v37 = vpop.f32.mrf.mxu1  ;;  %v1149_v30 = vadd.f32 %v1148_v7, %v1118_v29 }
 0x287   :  { %v1174_v48 = vadd.f32 %v1173_v37, %v1144_v43 }
 0x289   :  { %v1207_v52 = vadd.f32 %v1206_v44, %v1174_v48 }
 0x28b   :  { %v1234_v11 = vadd.f32 %v1233_v49, %v1207_v52 }
 0x28d   :  { %v1288_v32 = vand.u32 4294901760, %v1234_v11 }
 0x28e   :  { %v1179_v19 = vpop.f32.mrf.mxu1 }
 0x28f   :  { %v1289_v47 = vsub.f32 %v1234_v11, %v1288_v32  ;;  %v1180_v28 = vadd.f32 %v1179_v19, %v1149_v30  ;;  %1402 = vmatmul.f32.vlgmr.msra.gmra.mxu1 %v1288_v32 }
 0x291   :  { %v1211_v38 = vadd.f32 %v1210_v55, %v1180_v28  ;;  %1460 = vmatmul.f32.vlgmr.msrb.gmra.mxu2 %v1289_v47  ;;  %v1290_v40 = vand.u32 4294901760, %v1289_v47 }
 0x293   :  { %v1238_v61 = vadd.f32 %v1237_v42, %v1211_v38  ;;  %1504 = vmatmul.f32.vlgmr.msrb.gmra.mxu3 %v1290_v40  ;;  %v1291_v45 = vsub.f32 %v1289_v47, %v1290_v40 }
 0x295   :  { %v1296_v20 = vand.u32 4294901760, %v1238_v61  ;;  %v1292_v36 = vand.u32 4294901760, %v1291_v45 }
 0x297   :  { %1293 = vmatmul.f32.vlgmr.msra.gmra.mxu0 %v1292_v36  ;;  %1406 = vmatmul.f32.gmra.mxu1 %v1296_v20  ;;  %v1297_v57 = vsub.f32 %v1238_v61, %v1296_v20 }
 0x299   :  { %1465 = vmatmul.f32.gmra.mxu2 %v1297_v57  ;;  %v1298_v58 = vand.u32 4294901760, %v1297_v57 }
 0x29b   :  { %1510 = vmatmul.f32.gmra.mxu3 %v1298_v58  ;;  %v1299_v62 = vsub.f32 %v1297_v57, %v1298_v58 }
 0x29d   :  { %v1300_v8 = vand.u32 4294901760, %v1299_v62 }
 0x29f   :  { %1301 = vmatmul.f32.gmra.mxu0 %v1300_v8  ;;  %1620 = vmatmul.f32.vlgmr.msrb.gmra.mxu1 %v1288_v32 }
 0x2a7   :  { %1579 = vmatmul.f32.vlgmr.msrb.gmra.mxu0 %v1288_v32  ;;  %1624 = vmatmul.f32.gmra.mxu1 %v1296_v20 }
 0x2af   :  { %1583 = vmatmul.f32.gmra.mxu0 %v1296_v20 }
 0x30c   :  { %v1403_v10 = vpop.f32.mrf.mxu1 }
 0x314   :  { %v1294_v4 = vpop.f32.mrf.mxu0  ;;  %v1407_v17 = vpop.f32.mrf.mxu1 }
 0x315   :  { %v1404_v13 = vadd.f32 %v1403_v10, %v1294_v4  ;;  %v1461_v22 = vpop.f32.mrf.mxu2 }
 0x316   :  { %v1505_v23 = vpop.f32.mrf.mxu3 }
 0x317   :  { %v1462_v46 = vadd.f32 %v1461_v22, %v1404_v13 }
 0x319   :  { %v1506_v24 = vadd.f32 %v1505_v23, %v1462_v46 }
 0x31c   :  { %v1302_v41 = vpop.f32.mrf.mxu0  ;;  %v1621_v18 = vpop.f32.mrf.mxu1 }
 0x31d   :  { %v1408_v33 = vadd.f32 %v1407_v17, %v1302_v41  ;;  %v1466_v51 = vpop.f32.mrf.mxu2 }
 0x31e   :  { %v1511_v1 = vpop.f32.mrf.mxu3 }
 0x31f   :  { %v1467_v54 = vadd.f32 %v1466_v51, %v1408_v33 }
 0x321   :  { %v1512_v26 = vadd.f32 %v1511_v1, %v1467_v54 }
 0x324   :  { %v1580_v50 = vpop.f32.mrf.mxu0  ;;  %v1625_v34 = vpop.f32.mrf.mxu1 }
 0x325   :  { %v1581_v53 = vadd.f32 %v1580_v50, %v1506_v24 }
 0x327   :  { %v1622_v0 = vadd.f32 %v1621_v18, %v1581_v53 }
 0x329   :  { %v1628_v25 = vmax.f32 %v1622_v0, 0.0 }
 0x32b   :  { %1630 = vst [vmem:[#allocation10] sm:$0xff] %v1628_v25 }
 0x32c   :  { %v1584_v27 = vpop.f32.mrf.mxu0 }
 0x32d   :  { %v1585_v16 = vadd.f32 %v1584_v27, %v1512_v26 }
 0x32f   :  { %v1626_v39 = vadd.f32 %v1625_v34, %v1585_v16 }
 0x331   :  { %v1629_v60 = vmax.f32 %v1626_v39, 0.0 }
 0x333   :  { %1631 = vst [vmem:[#allocation10 + $0x8] sm:$0xff] %v1629_v60 }
 0x334   :  { %1644 = dma.vmem_to_hbm [thread:$0]  %s1637_s13, 256, %s1639_s0, [#allocation4], %s1894_s9, %s1894_s9, %s1895_s10  }
 0x335   :  { %1889 = dma.done.wait [#allocation4], 256  }
 0x336   :  { %1890 = vsyncadd [#allocation4], 4294967040 }
 0x337   :  { %1891 = dma.done.wait [#allocation12], 256  }
 0x338   :  { %1892 = vsyncadd [#allocation12], 4294967040 }
 0x339   :  { %1666 = vsyncpa [#allocation3], 1 }
 0x33a   :  { %1667 = vsyncpa [#allocation6], 1 }
 0x33b   :  { %1668 = vsyncpa [#allocation9], 1 }
 0x33c   :  { %1669 = vsyncpa [#allocation4], 1 }
 0x33d   :  { %1670 = vsyncpa [#allocation12], 1 }

</bundles_post_ra>
